<compile_context>
chip_gen: v6e
topology: v6e:2x2x1
jax: 0.10.0
libtpu: 0.0.40
codegen_flags: <defaults>
</compile_context>

<pallas_src>
import math

import jax
import jax.numpy as jnp
from jax import lax
from jax.experimental import pallas as pl
from jax.experimental.pallas import tpu as pltpu


def char_lstm_kernel(ids_ref, p_ref, whh_ref, out_ref, pre_scr):
    """ids_ref: (T*B_pad,) int32 in SMEM (scalar prefetch), time-major char ids.
    p_ref:   (n_char_pad, 4*Hp) f32 in VMEM, fused table emb @ W_ih + b.
    whh_ref: (Hp, 4*Hp) bf16 in VMEM, recurrent weights (gate order [i,f,o,g]).
    out_ref: (BT, Hp) f32, final hidden state for this batch tile.
    pre_scr: (T*BT, 4*Hp) f32 scratch holding gathered pre-activations."""
    BT, Hp = out_ref.shape
    T = pre_scr.shape[0] // BT
    col0 = pl.program_id(0) * BT          # first global batch column of this tile
    b_pad = pl.num_programs(0) * BT       # global padded batch size

    # Fused embedding + input projection: gather P rows (each 4 lane-aligned
    # vregs wide) into time-major pre-activation scratch.
    @pl.loop(0, T)
    def _(t):
        @pl.loop(0, BT)
        def _(bb):
            idx = ids_ref[t * b_pad + col0 + bb]
            pre_scr[pl.ds(t * BT + bb, 1), :] = p_ref[pl.ds(idx, 1), :]

    def step(t, carry):
        h, c = carry
        pre_t = pre_scr[pl.ds(t * BT, BT), :]                       # (BT, 4*Hp)
        # W_hh streamed from VMEM each step (NOT hoisted to a value); bf16 MXU
        # operands, f32 accumulate.
        gates = pre_t + jnp.dot(h.astype(jnp.bfloat16), whh_ref[...],
                                preferred_element_type=jnp.float32)
        # Gate layout is [i | f | o | g]: one sigmoid over the 3-gate slab.
        sig = jax.nn.sigmoid(gates[:, : 3 * Hp])
        i_g = sig[:, 0 * Hp:1 * Hp]
        f_g = sig[:, 1 * Hp:2 * Hp]
        o_g = sig[:, 2 * Hp:3 * Hp]
        g_g = jnp.tanh(gates[:, 3 * Hp:])
        c_new = f_g * c + i_g * g_g
        h_new = o_g * jnp.tanh(c_new)
        return (h_new, c_new)

    h0 = jnp.zeros((BT, Hp), jnp.float32)
    c0 = jnp.zeros((BT, Hp), jnp.float32)
    # Fully unrolled: T is small/static; h/c live in vregs across steps.
    h_T, _ = lax.fori_loop(0, T, step, (h0, c0), unroll=True)

    # CharLSTM.forward returns out[:, -1, :] == final hidden state.
    out_ref[...] = h_T


def _prep_gate_cols(w, H, Hp):
    """Reorder gate column blocks [i|f|g|o] -> [i|f|o|g] and zero-pad each
    block from H to Hp columns."""
    lead = w.shape[:-1]
    w4 = w.reshape(*lead, 4, H)
    w4 = jnp.take(w4, jnp.array([0, 1, 3, 2]), axis=-2)      # [i, f, o, g]
    pad = [(0, 0)] * (w4.ndim - 1) + [(0, Hp - H)]
    return jnp.pad(w4, pad).reshape(*lead, 4 * Hp)


def char_lstm_forward(char_ids, params):
    emb = params["embedding"]             # (n_char, D)
    w_ih = params["w_ih"]                 # (D, 4H)
    w_hh = params["w_hh"]                 # (H, 4H)
    b = params["b"]                       # (1, 4H)   (= b_ih + b_hh)

    B, T = char_ids.shape
    n_char = emb.shape[0]
    H = w_hh.shape[0]
    Hp = ((H + 127) // 128) * 128         # lane-aligned hidden size
    B_pad = max(8, ((B + 7) // 8) * 8)    # sublane-aligned batch
    BT = min(B_pad, 512)                  # batch tile (VMEM-safe on v5e/v6e/v7x)
    B_pad = ((B_pad + BT - 1) // BT) * BT
    n_tiles = B_pad // BT

    # Fused char-embedding + input-projection table: P[c] = emb[c] @ W_ih + b,
    # gate-permuted to [i,f,o,g] and gate-padded to Hp. Padded gate columns are
    # zero, and padded W_hh rows are zero, so padded h/c lanes stay harmless.
    P = emb.astype(jnp.float32) @ w_ih.astype(jnp.float32) + b.astype(jnp.float32)
    P = _prep_gate_cols(P, H, Hp)                                     # (n_char, 4Hp)
    nc_pad = ((n_char + 7) // 8) * 8
    P = jnp.pad(P, ((0, nc_pad - n_char), (0, 0)))                    # (nc_pad, 4Hp)

    whh_p = jnp.pad(w_hh.astype(jnp.float32), ((0, Hp - H), (0, 0)))  # (Hp, 4H)
    whh_p = _prep_gate_cols(whh_p, H, Hp).astype(jnp.bfloat16)        # (Hp, 4Hp) bf16

    # Time-major flattened char ids; padded batch rows get id 0 (their garbage
    # outputs are independent of real rows and sliced off at the end).
    ids = jnp.transpose(char_ids.astype(jnp.int32), (1, 0))           # (T, B)
    ids = jnp.pad(ids, ((0, 0), (0, B_pad - B)))                      # (T, B_pad)
    ids = ids.reshape(T * B_pad)

    out_p = pl.pallas_call(
        char_lstm_kernel,
        out_shape=jax.ShapeDtypeStruct((B_pad, Hp), jnp.float32),
        grid_spec=pltpu.PrefetchScalarGridSpec(
            num_scalar_prefetch=1,                 # ids -> SMEM
            grid=(n_tiles,),
            in_specs=[
                pl.BlockSpec(memory_space=pltpu.MemorySpace.VMEM),   # P table
                pl.BlockSpec(memory_space=pltpu.MemorySpace.VMEM),   # W_hh (bf16)
            ],
            out_specs=pl.BlockSpec((BT, Hp), lambda i, _ids: (i, 0)),
            scratch_shapes=[
                pltpu.VMEM((T * BT, 4 * Hp), jnp.float32),           # gathered pre-acts
            ],
        ),
        compiler_params=pltpu.CompilerParams(
            dimension_semantics=("parallel",)),
    )(ids, P, whh_p)

    return out_p[:B, :H]


def reference_char_lstm(char_ids, params):
    """Pure-JAX f32 reference matching torch.nn.Embedding + nn.LSTM(batch_first)."""
    emb = params["embedding"]
    w_ih = params["w_ih"]
    w_hh = params["w_hh"]
    b = params["b"]
    H = w_hh.shape[0]

    x = emb[char_ids].astype(jnp.float32)     # (B, T, D)
    B = x.shape[0]
    h0 = jnp.zeros((B, H), jnp.float32)
    c0 = jnp.zeros((B, H), jnp.float32)

    def step(carry, x_t):
        h, c = carry
        gates = x_t @ w_ih + h @ w_hh + b
        i_g = jax.nn.sigmoid(gates[:, 0 * H:1 * H])
        f_g = jax.nn.sigmoid(gates[:, 1 * H:2 * H])
        g_g = jnp.tanh(gates[:, 2 * H:3 * H])
        o_g = jax.nn.sigmoid(gates[:, 3 * H:4 * H])
        c_new = f_g * c + i_g * g_g
        h_new = o_g * jnp.tanh(c_new)
        return (h_new, c_new), h_new

    (h_T, _), _ = lax.scan(step, (h0, c0), jnp.transpose(x, (1, 0, 2)))
    return h_T


def init_params(key, n_char, char_dim, char_hidden):
    """Deterministic init mirroring PyTorch defaults (Embedding ~ N(0,1),
    LSTM weights/biases ~ U(-1/sqrt(H), 1/sqrt(H)))."""
    k1, k2, k3, k4, k5 = jax.random.split(key, 5)
    H = char_hidden
    stdv = 1.0 / math.sqrt(H)
    emb = jax.random.normal(k1, (n_char, char_dim), jnp.float32)
    w_ih = jax.random.uniform(k2, (char_dim, 4 * H), jnp.float32, -stdv, stdv)
    w_hh = jax.random.uniform(k3, (H, 4 * H), jnp.float32, -stdv, stdv)
    b_ih = jax.random.uniform(k4, (4 * H,), jnp.float32, -stdv, stdv)
    b_hh = jax.random.uniform(k5, (4 * H,), jnp.float32, -stdv, stdv)
    b = (b_ih + b_hh).reshape(1, 4 * H)
    return dict(embedding=emb, w_ih=w_ih, w_hh=w_hh, b=b)


if __name__ == "__main__":
    # Shapes implied by LSTMTagger(..., n_char, char_dim=10, char_hidden=50, ...):
    n_char, char_dim, char_hidden = 30, 10, 50
    B, T = 4, 8   # batch of 4 "words", each padded/truncated to 8 characters

    key = jax.random.PRNGKey(0)
    kp, kx = jax.random.split(key)
    params = init_params(kp, n_char, char_dim, char_hidden)
    char_ids = jax.random.randint(kx, (B, T), 0, n_char, dtype=jnp.int32)

    out = jax.jit(char_lstm_forward)(char_ids, params)
    out = jax.block_until_ready(out)

    ref = reference_char_lstm(char_ids, params)
    assert out.shape == (B, char_hidden), out.shape
    # Tolerance loosened vs. the pure-f32 version: W_hh is kept in bf16 for the
    # MXU (expected quantization error ~1e-2, not a bug).
    err = jnp.max(jnp.abs(out - ref))
    assert jnp.allclose(out, ref, rtol=2e-2, atol=2e-2), f"mismatch, max abs err={err}"

    print("KERNEL_OK")
</pallas_src>

<mosaic_0001>
module attributes {stable_mosaic.version = 11 : i64} {
  func.func @char_lstm_kernel(%arg0: i32, %arg1: memref<64xi32, #tpu.memory_space<smem>>, %arg2: memref<32x512xf32, #tpu.memory_space<vmem>>, %arg3: memref<128x512xbf16, #tpu.memory_space<vmem>>, %arg4: memref<8x128xf32, #tpu.memory_space<vmem>>, %arg5: memref<64x512xf32, #tpu.memory_space<vmem>>) attributes {dimension_semantics = [#tpu.dimension_semantics<parallel>], iteration_bounds = array<i64: 1>, scalar_prefetch = 1 : i64, scratch_operands = 1 : i64, tpu.core_type = #tpu.core_type<tc>, window_params = [{pipeline_mode = #tpu.pipeline_mode<synchronous>, transform_indices = @transform_0, window_bounds = array<i64: 32, 512>}, {pipeline_mode = #tpu.pipeline_mode<synchronous>, transform_indices = @transform_1, window_bounds = array<i64: 128, 512>}, {transform_indices = @transform_2, window_bounds = array<i64: 8, 128>}]} {
    %c8_i32 = arith.constant 8 : i32
    %0 = arith.muli %arg0, %c8_i32 : i32
    %c0_i32 = arith.constant 0 : i32
    %c8_i32_0 = arith.constant 8 : i32
    %1 = arith.addi %c0_i32, %c8_i32_0 : i32
    %c1_i32 = arith.constant 1 : i32
    scf.for %arg6 = %c0_i32 to %1 step %c1_i32  : i32 {
      %c1_i32_55 = arith.constant 1 : i32
      %189 = arith.muli %arg6, %c1_i32_55 : i32
      %c0_i32_56 = arith.constant 0 : i32
      %190 = arith.addi %c0_i32_56, %189 : i32
      %c0_i32_57 = arith.constant 0 : i32
      %c8_i32_58 = arith.constant 8 : i32
      %191 = arith.addi %c0_i32_57, %c8_i32_58 : i32
      %c1_i32_59 = arith.constant 1 : i32
      scf.for %arg7 = %c0_i32_57 to %191 step %c1_i32_59  : i32 {
        %c1_i32_61 = arith.constant 1 : i32
        %192 = arith.muli %arg7, %c1_i32_61 : i32
        %c0_i32_62 = arith.constant 0 : i32
        %193 = arith.addi %c0_i32_62, %192 : i32
        %c8_i32_63 = arith.constant 8 : i32
        %194 = arith.muli %190, %c8_i32_63 : i32
        %195 = arith.addi %194, %0 : i32
        %196 = arith.addi %195, %193 : i32
        %197 = arith.index_cast %196 : i32 to index
        %198 = memref.load %arg1[%197] : memref<64xi32, #tpu.memory_space<smem>>
        %199 = arith.index_cast %198 : i32 to index
        %c0_64 = arith.constant 0 : index
        %200 = vector.load %arg2[%199, %c0_64] : memref<32x512xf32, #tpu.memory_space<vmem>>, vector<1x512xf32>
        %c8_i32_65 = arith.constant 8 : i32
        %201 = arith.muli %190, %c8_i32_65 : i32
        %202 = arith.addi %201, %193 : i32
        %203 = arith.index_cast %202 : i32 to index
        %c0_66 = arith.constant 0 : index
        %204 = vector.load %arg5[%203, %c0_66] : memref<64x512xf32, #tpu.memory_space<vmem>>, vector<1x512xf32>
        tpu.vector_store %arg5[%203, %c0_66], %200 {strides = array<i32>} : memref<64x512xf32, #tpu.memory_space<vmem>>, vector<1x512xf32>,
      }
      %c8_i32_60 = arith.constant 8 : i32
    }
    %c8_i32_1 = arith.constant 8 : i32
    %cst = arith.constant 0.000000e+00 : f32
    %2 = vector.broadcast %cst : f32 to vector<8x128xf32>
    %cst_2 = arith.constant 0.000000e+00 : f32
    %3 = vector.broadcast %cst_2 : f32 to vector<8x128xf32>
    %c0_i32_3 = arith.constant 0 : i32
    %c8_i32_4 = arith.constant 8 : i32
    %4 = arith.muli %c0_i32_3, %c8_i32_4 : i32
    %5 = arith.index_cast %4 : i32 to index
    %c0 = arith.constant 0 : index
    %6 = vector.load %arg5[%5, %c0] : memref<64x512xf32, #tpu.memory_space<vmem>>, vector<8x512xf32>
    %7 = arith.truncf %2 : vector<8x128xf32> to vector<8x128xbf16>
    %c0_5 = arith.constant 0 : index
    %c0_6 = arith.constant 0 : index
    %8 = vector.load %arg3[%c0_5, %c0_6] : memref<128x512xbf16, #tpu.memory_space<vmem>>, vector<128x512xbf16>
    %cst_7 = arith.constant dense<0.000000e+00> : vector<8x512xf32>
    %9 = tpu.matmul %7, %8, %cst_7 {dimension_numbers = #tpu.dot_dimension_numbers<[1], [0], [0], [1], [0, 0, 1, 1], [], []>} : vector<8x128xbf16>, vector<128x512xbf16>, vector<8x512xf32> -> vector<8x512xf32>
    %10 = arith.addf %6, %9 : vector<8x512xf32>
    %11 = vector.extract_strided_slice %10 {offsets = [0, 0], sizes = [8, 384], strides = [1, 1]} : vector<8x512xf32> to vector<8x384xf32>
    %12 = arith.negf %11 : vector<8x384xf32>
    %13 = math.exp %12 : vector<8x384xf32>
    %cst_8 = arith.constant 1.000000e+00 : f32
    %14 = vector.broadcast %cst_8 : f32 to vector<8x384xf32>
    %15 = arith.addf %14, %13 : vector<8x384xf32>
    %16 = arith.divf %14, %15 : vector<8x384xf32>
    %17 = vector.extract_strided_slice %16 {offsets = [0, 0], sizes = [8, 128], strides = [1, 1]} : vector<8x384xf32> to vector<8x128xf32>
    %18 = vector.extract_strided_slice %16 {offsets = [0, 128], sizes = [8, 128], strides = [1, 1]} : vector<8x384xf32> to vector<8x128xf32>
    %19 = vector.extract_strided_slice %16 {offsets = [0, 256], sizes = [8, 128], strides = [1, 1]} : vector<8x384xf32> to vector<8x128xf32>
    %20 = vector.extract_strided_slice %10 {offsets = [0, 384], sizes = [8, 128], strides = [1, 1]} : vector<8x512xf32> to vector<8x128xf32>
    %21 = math.tanh %20 : vector<8x128xf32>
    %22 = arith.mulf %18, %3 : vector<8x128xf32>
    %23 = arith.mulf %17, %21 : vector<8x128xf32>
    %24 = arith.addf %22, %23 : vector<8x128xf32>
    %25 = math.tanh %24 : vector<8x128xf32>
    %26 = arith.mulf %19, %25 : vector<8x128xf32>
    %c1_i32_9 = arith.constant 1 : i32
    %c8_i32_10 = arith.constant 8 : i32
    %27 = arith.muli %c1_i32_9, %c8_i32_10 : i32
    %28 = arith.index_cast %27 : i32 to index
    %c0_11 = arith.constant 0 : index
    %29 = vector.load %arg5[%28, %c0_11] : memref<64x512xf32, #tpu.memory_space<vmem>>, vector<8x512xf32>
    %30 = arith.truncf %26 : vector<8x128xf32> to vector<8x128xbf16>
    %c0_12 = arith.constant 0 : index
    %c0_13 = arith.constant 0 : index
    %31 = vector.load %arg3[%c0_12, %c0_13] : memref<128x512xbf16, #tpu.memory_space<vmem>>, vector<128x512xbf16>
    %cst_14 = arith.constant dense<0.000000e+00> : vector<8x512xf32>
    %32 = tpu.matmul %30, %31, %cst_14 {dimension_numbers = #tpu.dot_dimension_numbers<[1], [0], [0], [1], [0, 0, 1, 1], [], []>} : vector<8x128xbf16>, vector<128x512xbf16>, vector<8x512xf32> -> vector<8x512xf32>
    %33 = arith.addf %29, %32 : vector<8x512xf32>
    %34 = vector.extract_strided_slice %33 {offsets = [0, 0], sizes = [8, 384], strides = [1, 1]} : vector<8x512xf32> to vector<8x384xf32>
    %35 = arith.negf %34 : vector<8x384xf32>
    %36 = math.exp %35 : vector<8x384xf32>
    %cst_15 = arith.constant 1.000000e+00 : f32
    %37 = vector.broadcast %cst_15 : f32 to vector<8x384xf32>
    %38 = arith.addf %37, %36 : vector<8x384xf32>
    %39 = arith.divf %37, %38 : vector<8x384xf32>
    %40 = vector.extract_strided_slice %39 {offsets = [0, 0], sizes = [8, 128], strides = [1, 1]} : vector<8x384xf32> to vector<8x128xf32>
    %41 = vector.extract_strided_slice %39 {offsets = [0, 128], sizes = [8, 128], strides = [1, 1]} : vector<8x384xf32> to vector<8x128xf32>
    %42 = vector.extract_strided_slice %39 {offsets = [0, 256], sizes = [8, 128], strides = [1, 1]} : vector<8x384xf32> to vector<8x128xf32>
    %43 = vector.extract_strided_slice %33 {offsets = [0, 384], sizes = [8, 128], strides = [1, 1]} : vector<8x512xf32> to vector<8x128xf32>
    %44 = math.tanh %43 : vector<8x128xf32>
    %45 = arith.mulf %41, %24 : vector<8x128xf32>
    %46 = arith.mulf %40, %44 : vector<8x128xf32>
    %47 = arith.addf %45, %46 : vector<8x128xf32>
    %48 = math.tanh %47 : vector<8x128xf32>
    %49 = arith.mulf %42, %48 : vector<8x128xf32>
    %c2_i32 = arith.constant 2 : i32
    %c8_i32_16 = arith.constant 8 : i32
    %50 = arith.muli %c2_i32, %c8_i32_16 : i32
    %51 = arith.index_cast %50 : i32 to index
    %c0_17 = arith.constant 0 : index
    %52 = vector.load %arg5[%51, %c0_17] : memref<64x512xf32, #tpu.memory_space<vmem>>, vector<8x512xf32>
    %53 = arith.truncf %49 : vector<8x128xf32> to vector<8x128xbf16>
    %c0_18 = arith.constant 0 : index
    %c0_19 = arith.constant 0 : index
    %54 = vector.load %arg3[%c0_18, %c0_19] : memref<128x512xbf16, #tpu.memory_space<vmem>>, vector<128x512xbf16>
    %cst_20 = arith.constant dense<0.000000e+00> : vector<8x512xf32>
    %55 = tpu.matmul %53, %54, %cst_20 {dimension_numbers = #tpu.dot_dimension_numbers<[1], [0], [0], [1], [0, 0, 1, 1], [], []>} : vector<8x128xbf16>, vector<128x512xbf16>, vector<8x512xf32> -> vector<8x512xf32>
    %56 = arith.addf %52, %55 : vector<8x512xf32>
    %57 = vector.extract_strided_slice %56 {offsets = [0, 0], sizes = [8, 384], strides = [1, 1]} : vector<8x512xf32> to vector<8x384xf32>
    %58 = arith.negf %57 : vector<8x384xf32>
    %59 = math.exp %58 : vector<8x384xf32>
    %cst_21 = arith.constant 1.000000e+00 : f32
    %60 = vector.broadcast %cst_21 : f32 to vector<8x384xf32>
    %61 = arith.addf %60, %59 : vector<8x384xf32>
    %62 = arith.divf %60, %61 : vector<8x384xf32>
    %63 = vector.extract_strided_slice %62 {offsets = [0, 0], sizes = [8, 128], strides = [1, 1]} : vector<8x384xf32> to vector<8x128xf32>
    %64 = vector.extract_strided_slice %62 {offsets = [0, 128], sizes = [8, 128], strides = [1, 1]} : vector<8x384xf32> to vector<8x128xf32>
    %65 = vector.extract_strided_slice %62 {offsets = [0, 256], sizes = [8, 128], strides = [1, 1]} : vector<8x384xf32> to vector<8x128xf32>
    %66 = vector.extract_strided_slice %56 {offsets = [0, 384], sizes = [8, 128], strides = [1, 1]} : vector<8x512xf32> to vector<8x128xf32>
    %67 = math.tanh %66 : vector<8x128xf32>
    %68 = arith.mulf %64, %47 : vector<8x128xf32>
    %69 = arith.mulf %63, %67 : vector<8x128xf32>
    %70 = arith.addf %68, %69 : vector<8x128xf32>
    %71 = math.tanh %70 : vector<8x128xf32>
    %72 = arith.mulf %65, %71 : vector<8x128xf32>
    %c3_i32 = arith.constant 3 : i32
    %c8_i32_22 = arith.constant 8 : i32
    %73 = arith.muli %c3_i32, %c8_i32_22 : i32
    %74 = arith.index_cast %73 : i32 to index
    %c0_23 = arith.constant 0 : index
    %75 = vector.load %arg5[%74, %c0_23] : memref<64x512xf32, #tpu.memory_space<vmem>>, vector<8x512xf32>
    %76 = arith.truncf %72 : vector<8x128xf32> to vector<8x128xbf16>
    %c0_24 = arith.constant 0 : index
    %c0_25 = arith.constant 0 : index
    %77 = vector.load %arg3[%c0_24, %c0_25] : memref<128x512xbf16, #tpu.memory_space<vmem>>, vector<128x512xbf16>
    %cst_26 = arith.constant dense<0.000000e+00> : vector<8x512xf32>
    %78 = tpu.matmul %76, %77, %cst_26 {dimension_numbers = #tpu.dot_dimension_numbers<[1], [0], [0], [1], [0, 0, 1, 1], [], []>} : vector<8x128xbf16>, vector<128x512xbf16>, vector<8x512xf32> -> vector<8x512xf32>
    %79 = arith.addf %75, %78 : vector<8x512xf32>
    %80 = vector.extract_strided_slice %79 {offsets = [0, 0], sizes = [8, 384], strides = [1, 1]} : vector<8x512xf32> to vector<8x384xf32>
    %81 = arith.negf %80 : vector<8x384xf32>
    %82 = math.exp %81 : vector<8x384xf32>
    %cst_27 = arith.constant 1.000000e+00 : f32
    %83 = vector.broadcast %cst_27 : f32 to vector<8x384xf32>
    %84 = arith.addf %83, %82 : vector<8x384xf32>
    %85 = arith.divf %83, %84 : vector<8x384xf32>
    %86 = vector.extract_strided_slice %85 {offsets = [0, 0], sizes = [8, 128], strides = [1, 1]} : vector<8x384xf32> to vector<8x128xf32>
    %87 = vector.extract_strided_slice %85 {offsets = [0, 128], sizes = [8, 128], strides = [1, 1]} : vector<8x384xf32> to vector<8x128xf32>
    %88 = vector.extract_strided_slice %85 {offsets = [0, 256], sizes = [8, 128], strides = [1, 1]} : vector<8x384xf32> to vector<8x128xf32>
    %89 = vector.extract_strided_slice %79 {offsets = [0, 384], sizes = [8, 128], strides = [1, 1]} : vector<8x512xf32> to vector<8x128xf32>
    %90 = math.tanh %89 : vector<8x128xf32>
    %91 = arith.mulf %87, %70 : vector<8x128xf32>
    %92 = arith.mulf %86, %90 : vector<8x128xf32>
    %93 = arith.addf %91, %92 : vector<8x128xf32>
    %94 = math.tanh %93 : vector<8x128xf32>
    %95 = arith.mulf %88, %94 : vector<8x128xf32>
    %c4_i32 = arith.constant 4 : i32
    %c8_i32_28 = arith.constant 8 : i32
    %96 = arith.muli %c4_i32, %c8_i32_28 : i32
    %97 = arith.index_cast %96 : i32 to index
    %c0_29 = arith.constant 0 : index
    %98 = vector.load %arg5[%97, %c0_29] : memref<64x512xf32, #tpu.memory_space<vmem>>, vector<8x512xf32>
    %99 = arith.truncf %95 : vector<8x128xf32> to vector<8x128xbf16>
    %c0_30 = arith.constant 0 : index
    %c0_31 = arith.constant 0 : index
    %100 = vector.load %arg3[%c0_30, %c0_31] : memref<128x512xbf16, #tpu.memory_space<vmem>>, vector<128x512xbf16>
    %cst_32 = arith.constant dense<0.000000e+00> : vector<8x512xf32>
    %101 = tpu.matmul %99, %100, %cst_32 {dimension_numbers = #tpu.dot_dimension_numbers<[1], [0], [0], [1], [0, 0, 1, 1], [], []>} : vector<8x128xbf16>, vector<128x512xbf16>, vector<8x512xf32> -> vector<8x512xf32>
    %102 = arith.addf %98, %101 : vector<8x512xf32>
    %103 = vector.extract_strided_slice %102 {offsets = [0, 0], sizes = [8, 384], strides = [1, 1]} : vector<8x512xf32> to vector<8x384xf32>
    %104 = arith.negf %103 : vector<8x384xf32>
    %105 = math.exp %104 : vector<8x384xf32>
    %cst_33 = arith.constant 1.000000e+00 : f32
    %106 = vector.broadcast %cst_33 : f32 to vector<8x384xf32>
    %107 = arith.addf %106, %105 : vector<8x384xf32>
    %108 = arith.divf %106, %107 : vector<8x384xf32>
    %109 = vector.extract_strided_slice %108 {offsets = [0, 0], sizes = [8, 128], strides = [1, 1]} : vector<8x384xf32> to vector<8x128xf32>
    %110 = vector.extract_strided_slice %108 {offsets = [0, 128], sizes = [8, 128], strides = [1, 1]} : vector<8x384xf32> to vector<8x128xf32>
    %111 = vector.extract_strided_slice %108 {offsets = [0, 256], sizes = [8, 128], strides = [1, 1]} : vector<8x384xf32> to vector<8x128xf32>
    %112 = vector.extract_strided_slice %102 {offsets = [0, 384], sizes = [8, 128], strides = [1, 1]} : vector<8x512xf32> to vector<8x128xf32>
    %113 = math.tanh %112 : vector<8x128xf32>
    %114 = arith.mulf %110, %93 : vector<8x128xf32>
    %115 = arith.mulf %109, %113 : vector<8x128xf32>
    %116 = arith.addf %114, %115 : vector<8x128xf32>
    %117 = math.tanh %116 : vector<8x128xf32>
    %118 = arith.mulf %111, %117 : vector<8x128xf32>
    %c5_i32 = arith.constant 5 : i32
    %c8_i32_34 = arith.constant 8 : i32
    %119 = arith.muli %c5_i32, %c8_i32_34 : i32
    %120 = arith.index_cast %119 : i32 to index
    %c0_35 = arith.constant 0 : index
    %121 = vector.load %arg5[%120, %c0_35] : memref<64x512xf32, #tpu.memory_space<vmem>>, vector<8x512xf32>
    %122 = arith.truncf %118 : vector<8x128xf32> to vector<8x128xbf16>
    %c0_36 = arith.constant 0 : index
    %c0_37 = arith.constant 0 : index
    %123 = vector.load %arg3[%c0_36, %c0_37] : memref<128x512xbf16, #tpu.memory_space<vmem>>, vector<128x512xbf16>
    %cst_38 = arith.constant dense<0.000000e+00> : vector<8x512xf32>
    %124 = tpu.matmul %122, %123, %cst_38 {dimension_numbers = #tpu.dot_dimension_numbers<[1], [0], [0], [1], [0, 0, 1, 1], [], []>} : vector<8x128xbf16>, vector<128x512xbf16>, vector<8x512xf32> -> vector<8x512xf32>
    %125 = arith.addf %121, %124 : vector<8x512xf32>
    %126 = vector.extract_strided_slice %125 {offsets = [0, 0], sizes = [8, 384], strides = [1, 1]} : vector<8x512xf32> to vector<8x384xf32>
    %127 = arith.negf %126 : vector<8x384xf32>
    %128 = math.exp %127 : vector<8x384xf32>
    %cst_39 = arith.constant 1.000000e+00 : f32
    %129 = vector.broadcast %cst_39 : f32 to vector<8x384xf32>
    %130 = arith.addf %129, %128 : vector<8x384xf32>
    %131 = arith.divf %129, %130 : vector<8x384xf32>
    %132 = vector.extract_strided_slice %131 {offsets = [0, 0], sizes = [8, 128], strides = [1, 1]} : vector<8x384xf32> to vector<8x128xf32>
    %133 = vector.extract_strided_slice %131 {offsets = [0, 128], sizes = [8, 128], strides = [1, 1]} : vector<8x384xf32> to vector<8x128xf32>
    %134 = vector.extract_strided_slice %131 {offsets = [0, 256], sizes = [8, 128], strides = [1, 1]} : vector<8x384xf32> to vector<8x128xf32>
    %135 = vector.extract_strided_slice %125 {offsets = [0, 384], sizes = [8, 128], strides = [1, 1]} : vector<8x512xf32> to vector<8x128xf32>
    %136 = math.tanh %135 : vector<8x128xf32>
    %137 = arith.mulf %133, %116 : vector<8x128xf32>
    %138 = arith.mulf %132, %136 : vector<8x128xf32>
    %139 = arith.addf %137, %138 : vector<8x128xf32>
    %140 = math.tanh %139 : vector<8x128xf32>
    %141 = arith.mulf %134, %140 : vector<8x128xf32>
    %c6_i32 = arith.constant 6 : i32
    %c8_i32_40 = arith.constant 8 : i32
    %142 = arith.muli %c6_i32, %c8_i32_40 : i32
    %143 = arith.index_cast %142 : i32 to index
    %c0_41 = arith.constant 0 : index
    %144 = vector.load %arg5[%143, %c0_41] : memref<64x512xf32, #tpu.memory_space<vmem>>, vector<8x512xf32>
    %145 = arith.truncf %141 : vector<8x128xf32> to vector<8x128xbf16>
    %c0_42 = arith.constant 0 : index
    %c0_43 = arith.constant 0 : index
    %146 = vector.load %arg3[%c0_42, %c0_43] : memref<128x512xbf16, #tpu.memory_space<vmem>>, vector<128x512xbf16>
    %cst_44 = arith.constant dense<0.000000e+00> : vector<8x512xf32>
    %147 = tpu.matmul %145, %146, %cst_44 {dimension_numbers = #tpu.dot_dimension_numbers<[1], [0], [0], [1], [0, 0, 1, 1], [], []>} : vector<8x128xbf16>, vector<128x512xbf16>, vector<8x512xf32> -> vector<8x512xf32>
    %148 = arith.addf %144, %147 : vector<8x512xf32>
    %149 = vector.extract_strided_slice %148 {offsets = [0, 0], sizes = [8, 384], strides = [1, 1]} : vector<8x512xf32> to vector<8x384xf32>
    %150 = arith.negf %149 : vector<8x384xf32>
    %151 = math.exp %150 : vector<8x384xf32>
    %cst_45 = arith.constant 1.000000e+00 : f32
    %152 = vector.broadcast %cst_45 : f32 to vector<8x384xf32>
    %153 = arith.addf %152, %151 : vector<8x384xf32>
    %154 = arith.divf %152, %153 : vector<8x384xf32>
    %155 = vector.extract_strided_slice %154 {offsets = [0, 0], sizes = [8, 128], strides = [1, 1]} : vector<8x384xf32> to vector<8x128xf32>
    %156 = vector.extract_strided_slice %154 {offsets = [0, 128], sizes = [8, 128], strides = [1, 1]} : vector<8x384xf32> to vector<8x128xf32>
    %157 = vector.extract_strided_slice %154 {offsets = [0, 256], sizes = [8, 128], strides = [1, 1]} : vector<8x384xf32> to vector<8x128xf32>
    %158 = vector.extract_strided_slice %148 {offsets = [0, 384], sizes = [8, 128], strides = [1, 1]} : vector<8x512xf32> to vector<8x128xf32>
    %159 = math.tanh %158 : vector<8x128xf32>
    %160 = arith.mulf %156, %139 : vector<8x128xf32>
    %161 = arith.mulf %155, %159 : vector<8x128xf32>
    %162 = arith.addf %160, %161 : vector<8x128xf32>
    %163 = math.tanh %162 : vector<8x128xf32>
    %164 = arith.mulf %157, %163 : vector<8x128xf32>
    %c7_i32 = arith.constant 7 : i32
    %c8_i32_46 = arith.constant 8 : i32
    %165 = arith.muli %c7_i32, %c8_i32_46 : i32
    %166 = arith.index_cast %165 : i32 to index
    %c0_47 = arith.constant 0 : index
    %167 = vector.load %arg5[%166, %c0_47] : memref<64x512xf32, #tpu.memory_space<vmem>>, vector<8x512xf32>
    %168 = arith.truncf %164 : vector<8x128xf32> to vector<8x128xbf16>
    %c0_48 = arith.constant 0 : index
    %c0_49 = arith.constant 0 : index
    %169 = vector.load %arg3[%c0_48, %c0_49] : memref<128x512xbf16, #tpu.memory_space<vmem>>, vector<128x512xbf16>
    %cst_50 = arith.constant dense<0.000000e+00> : vector<8x512xf32>
    %170 = tpu.matmul %168, %169, %cst_50 {dimension_numbers = #tpu.dot_dimension_numbers<[1], [0], [0], [1], [0, 0, 1, 1], [], []>} : vector<8x128xbf16>, vector<128x512xbf16>, vector<8x512xf32> -> vector<8x512xf32>
    %171 = arith.addf %167, %170 : vector<8x512xf32>
    %172 = vector.extract_strided_slice %171 {offsets = [0, 0], sizes = [8, 384], strides = [1, 1]} : vector<8x512xf32> to vector<8x384xf32>
    %173 = arith.negf %172 : vector<8x384xf32>
    %174 = math.exp %173 : vector<8x384xf32>
    %cst_51 = arith.constant 1.000000e+00 : f32
    %175 = vector.broadcast %cst_51 : f32 to vector<8x384xf32>
    %176 = arith.addf %175, %174 : vector<8x384xf32>
    %177 = arith.divf %175, %176 : vector<8x384xf32>
    %178 = vector.extract_strided_slice %177 {offsets = [0, 0], sizes = [8, 128], strides = [1, 1]} : vector<8x384xf32> to vector<8x128xf32>
    %179 = vector.extract_strided_slice %177 {offsets = [0, 128], sizes = [8, 128], strides = [1, 1]} : vector<8x384xf32> to vector<8x128xf32>
    %180 = vector.extract_strided_slice %177 {offsets = [0, 256], sizes = [8, 128], strides = [1, 1]} : vector<8x384xf32> to vector<8x128xf32>
    %181 = vector.extract_strided_slice %171 {offsets = [0, 384], sizes = [8, 128], strides = [1, 1]} : vector<8x512xf32> to vector<8x128xf32>
    %182 = math.tanh %181 : vector<8x128xf32>
    %183 = arith.mulf %179, %162 : vector<8x128xf32>
    %184 = arith.mulf %178, %182 : vector<8x128xf32>
    %185 = arith.addf %183, %184 : vector<8x128xf32>
    %186 = math.tanh %185 : vector<8x128xf32>
    %187 = arith.mulf %180, %186 : vector<8x128xf32>
    %c8_i32_52 = arith.constant 8 : i32
    %c0_53 = arith.constant 0 : index
    %c0_54 = arith.constant 0 : index
    %188 = vector.load %arg4[%c0_53, %c0_54] : memref<8x128xf32, #tpu.memory_space<vmem>>, vector<8x128xf32>
    tpu.vector_store %arg4[%c0_53, %c0_54], %187 {strides = array<i32>} : memref<8x128xf32, #tpu.memory_space<vmem>>, vector<8x128xf32>,
    return
  }
  func.func @transform_0(%arg0: i32, %arg1: memref<64xi32, #tpu.memory_space<smem>>) -> (i32, i32) {
    %c0_i32 = arith.constant 0 : i32
    %c0_i32_0 = arith.constant 0 : i32
    %c0_i32_1 = arith.constant 0 : i32
    return %c0_i32, %c0_i32_0 : i32, i32
  }
  func.func @transform_1(%arg0: i32, %arg1: memref<64xi32, #tpu.memory_space<smem>>) -> (i32, i32) {
    %c0_i32 = arith.constant 0 : i32
    %c0_i32_0 = arith.constant 0 : i32
    %c0_i32_1 = arith.constant 0 : i32
    return %c0_i32, %c0_i32_0 : i32, i32
  }
  func.func @transform_2(%arg0: i32, %arg1: memref<64xi32, #tpu.memory_space<smem>>) -> (i32, i32) {
    %c0_i32 = arith.constant 0 : i32
    %c0_i32_0 = arith.constant 0 : i32
    return %arg0, %c0_i32 : i32, i32
  }
}

</mosaic_0001>

<bundles_post_ra>
// kernel: char_lstm_forward.1
= control target key start
LH: loop header
LB: loop body
LE: loop exit
PB: predicated region body
PF: predicated region fallthrough
CT: control target
= control target key end

     0   :  { %s2066_s0 = inlined_call_operand.vmem [shape: s32[64], index: 0, kind: input, shape index: {}]   ;;  %s2067_s1 = inlined_call_operand.vmem [shape: f32[32,512], index: 1, kind: input, shape index: {}]   ;;  %s2068_s2 = inlined_call_operand.vmem [shape: bf16[128,512], index: 2, kind: input, shape index: {}]   ;;  %s2069_s3 = inlined_call_operand.vmem [shape: f32[8,128], index: 3, kind: output, shape index: {}]  }
   0x1   :  { %s8_s14 = sshll.u32 %s2066_s0, 4  ;;  %s9_s14 = int_to_ptr.vmem [resolvable:$true] %s8_s14 }
   0x2   :  { %s1480_s15 = scalar_lea.vmem %s9_s14, 16  ;;  %p1485_p1 = scmp.lt.s32.totalorder %s9_s14, %s9_s14 }
   0x3   :  { %p1481_p0 = scmp.ne.s32.totalorder %s9_s14, %s1480_s15  ;;  %p1486_p2 = scmp.lt.s32.totalorder %s1480_s15, %s1480_s15 }
   0x5   :  { %p1487_p3 = por %p1486_p2, %p1485_p1 }
   0x7   :  { %p1488_p4 = pnand %p1487_p3, %p1481_p0 }
   0x9   :  { %1491 = shalt.err (!%p1488_p4)  }
   0xa   :  { %s1510_s16 = smov [#allocation4]  }
   0xb   :  { %11 = dma.vmem_to_smem %s9_s14, 16, %s1510_s16, [#allocation3] }
   0xc   :  { %1500 = dma.done.wait [#allocation3], 16 }
   0xd   :  { %1501 = vsyncadd [#allocation3], 4294967280 }
   0xe   :  { %13 = sfence }
   0xf   :  { %s1535_s17 = smov 0  }
  0x10 LB: > { %s1506_s0 = smov 0   ;;  %s1504_s17 = sphi %s1535_s17, %s25_s17  }
  0x11 LB: >> { %s1192_s18 = sshll.u32 %s1504_s17, 3  ;;  %v46_v0 = vlaneseq  ;;  %s1508_s0 = sphi %s1506_s0, %s31_s0  }
  0x12   : >> { %s34_s19 = sadd.s32 %s1508_s0, %s1192_s18  ;;  %s31_s0 = sadd.s32 1, %s1508_s0  }
  0x13   : >> { %s35_s20 = sld [smem:[#allocation4 + %s34_s19]]  ;;  %s50_s21 = sshra.s32 %s34_s19, 3  ;;  %vm48_vm0 = vcmp.lt.s32.totalorder %v46_v0, 512 }
  0x14   : >> { %s53_s22 = sand.u32 7, %s34_s19  ;;  %s1254_s23 = sshll.u32 %s50_s21, 5 }
  0x15   : >> { %s56_s24 = sadd.s32 %s1254_s23, %s53_s22  ;;  %p28_p5 = scmp.ge.s32.totalorder %s31_s0, 8  }
  0x16   : >> { %s57_s5 = scalar_lea.vmem [#allocation2], %s56_s24  ;;  %s25_s17 = sadd.s32 (%p28_p5), 1, %s1504_s17  }
  0x17   : > { %p22_p6 = scmp.ge.s32.totalorder (%p28_p5), %s25_s17, 8  }
  0x19   : >> { %s36_s25 = sshra.s32 %s35_s20, 3  ;;  %s39_s26 = sand.u32 7, %s35_s20 }
  0x1a   : >> { %s1253_s27 = sshll.u32 %s36_s25, 5  ;;  %30 = sbr.rel (!%p28_p5) target bundleno = 17 (0x11), region = 44 }
  0x1b   : >> { %s42_s28 = sadd.s32 %s1253_s27, %s39_s26 }
  0x1c   : >> { %s43_s4 = scalar_lea.vmem %s2067_s1, %s42_s28 }
  0x1d   : >> { %v44_v1 = vld [vmem:[%s43_s4] ss:$8 sm:$0xf] }
  0x1e   : >> { %58 = vst.msk [vmem:[%s57_s5] ss:$8 sm:$0xf] %vm48_vm0, %v44_v1 }
  0x1f   :  { %24 = sbr.rel (!%p22_p6) target bundleno = 16 (0x10), region = 55  ;;  %v1546_v2 = vld [vmem:[%s2068_s2 + $0xe4] ss:$16 sps:$4 sm:$0xff] (%p22_p6)   ;;  %v1551_v3 = vld [vmem:[%s2068_s2 + $0xe0] ss:$16 sps:$4 sm:$0xff] (%p22_p6)   ;;  %v1511_v4 = vmov (%p22_p6), 0  }
  0x20   :  { %288 = vmatprep.mubr.bf16.mxu0 (%p22_p6), %v1511_v4  ;;  %329 = vmatprep.mubr.bf16.mxu1 (%p22_p6), %v1511_v4  ;;  %v1559_v5 = vld [vmem:[%s2068_s2 + $0xc4] ss:$16 sps:$4 sm:$0xff] (%p22_p6)   ;;  %v1565_v6 = vld [vmem:[%s2068_s2 + $0xc0] ss:$16 sps:$4 sm:$0xff] (%p22_p6)   ;;  %v1576_v8 = vld [vmem:[%s2068_s2 + $0xec] ss:$16 sps:$4 sm:$0xff] (%p22_p6)  }
  0x21   :  { %256 = vmatprep.subr.bf16.mxu0 (%p22_p6), %v1546_v2  ;;  %v1571_v7 = vld [vmem:[%s2068_s2 + $0xa4] ss:$16 sps:$4 sm:$0xff] (%p22_p6)   ;;  %v1581_v9 = vld [vmem:[%s2068_s2 + $0xe8] ss:$16 sps:$4 sm:$0xff] (%p22_p6)   ;;  %v1587_v10 = vld [vmem:[%s2068_s2 + $0xa0] ss:$16 sps:$4 sm:$0xff] (%p22_p6)   ;;  %297 = vmatprep.subr.bf16.mxu1 (%p22_p6), %v1576_v8 }
  0x22   :  { %257 = vmatpush1.bf16.msra.mxu0 (%p22_p6), %v1551_v3  ;;  %v1594_v11 = vld [vmem:[%s2068_s2 + $0x84] ss:$16 sps:$4 sm:$0xff] (%p22_p6)   ;;  %298 = vmatpush1.bf16.msra.mxu1 (%p22_p6), %v1581_v9  ;;  %v1600_v12 = vld [vmem:[%s2068_s2 + $0xcc] ss:$16 sps:$4 sm:$0xff] (%p22_p6)   ;;  %v1605_v13 = vld [vmem:[%s2068_s2 + $0xc8] ss:$16 sps:$4 sm:$0xff] (%p22_p6)  }
  0x23   :  { %258 = vmatprep.subr.bf16.mxu0 (%p22_p6), %v1559_v5  ;;  %299 = vmatprep.subr.bf16.mxu1 (%p22_p6), %v1600_v12  ;;  %v1612_v14 = vld [vmem:[%s2068_s2 + $0x80] ss:$16 sps:$4 sm:$0xff] (%p22_p6)   ;;  %v1617_v15 = vld [vmem:[%s2068_s2 + $0x64] ss:$16 sps:$4 sm:$0xff] (%p22_p6)   ;;  %v1622_v16 = vld [vmem:[%s2068_s2 + $0xac] ss:$16 sps:$4 sm:$0xff] (%p22_p6)  }
  0x24   :  { %v1629_v17 = vld [vmem:[%s2068_s2 + $0xa8] ss:$16 sps:$4 sm:$0xff]   ;;  %v1635_v18 = vld [vmem:[%s2068_s2 + $0x8c] ss:$16 sps:$4 sm:$0xff]   ;;  %v1641_v19 = vld [vmem:[%s2068_s2 + $0x60] ss:$16 sps:$4 sm:$0xff]  }
  0x25   :  { %v1647_v20 = vld [vmem:[%s2068_s2 + $0x44] ss:$16 sps:$4 sm:$0xff]   ;;  %v1653_v21 = vld [vmem:[%s2068_s2 + $0x88] ss:$16 sps:$4 sm:$0xff]   ;;  %v1659_v22 = vld [vmem:[%s2068_s2 + $0x6c] ss:$16 sps:$4 sm:$0xff]  }
  0x26   :  { %259 = vmatpush1.bf16.msra.mxu0 %v1565_v6  ;;  %300 = vmatpush1.bf16.msra.mxu1 %v1605_v13  ;;  %v1665_v23 = vld [vmem:[%s2068_s2 + $0x40] ss:$16 sps:$4 sm:$0xff]   ;;  %v1670_v24 = vld [vmem:[%s2068_s2 + $0x24] ss:$16 sps:$4 sm:$0xff]   ;;  %v1677_v25 = vld [vmem:[%s2068_s2 + $0x68] ss:$16 sps:$4 sm:$0xff]  }
  0x27   :  { %260 = vmatprep.subr.bf16.mxu0 %v1571_v7  ;;  %301 = vmatprep.subr.bf16.mxu1 %v1622_v16  ;;  %v1683_v26 = vld [vmem:[%s2068_s2 + $0x4c] ss:$16 sps:$4 sm:$0xff]   ;;  %v1689_v27 = vld [vmem:[%s2068_s2 + $0x20] ss:$16 sps:$4 sm:$0xff]   ;;  %v1695_v28 = vld [vmem:[%s2068_s2 + $0x4] ss:$16 sps:$4 sm:$0xff]  }
  0x28   :  { %v1701_v29 = vld [vmem:[%s2068_s2 + $0x48] ss:$16 sps:$4 sm:$0xff]   ;;  %v1707_v30 = vld [vmem:[%s2068_s2 + $0x2c] ss:$16 sps:$4 sm:$0xff]   ;;  %v1713_v31 = vld [vmem:[%s2068_s2] ss:$16 sps:$4 sm:$0xff]  }
  0x29   :  { %v1720_v32 = vld [vmem:[%s2068_s2 + $0x28] ss:$16 sps:$4 sm:$0xff]   ;;  %v1726_v33 = vld [vmem:[%s2068_s2 + $0xc] ss:$16 sps:$4 sm:$0xff]   ;;  %v60_v35 = vld [vmem:[#allocation2] sm:$0xff] }
  0x2a   :  { %261 = vmatpush1.bf16.msra.mxu0 %v1587_v10  ;;  %302 = vmatpush1.bf16.msra.mxu1 %v1629_v17  ;;  %v1733_v34 = vld [vmem:[%s2068_s2 + $0x8] ss:$16 sps:$4 sm:$0xff]   ;;  %v62_v47 = vld [vmem:[#allocation2 + $0x10] sm:$0xff] }
  0x2b   :  { %262 = vmatprep.subr.bf16.mxu0 %v1594_v11  ;;  %303 = vmatprep.subr.bf16.mxu1 %v1635_v18  ;;  %v61_v37 = vld [vmem:[#allocation2 + $0x8] sm:$0xff]  ;;  %v63_v51 = vld [vmem:[#allocation2 + $0x18] sm:$0xff] }
  0x2e   :  { %263 = vmatpush1.bf16.msra.mxu0 %v1612_v14  ;;  %304 = vmatpush1.bf16.msra.mxu1 %v1653_v21 }
  0x2f   :  { %264 = vmatprep.subr.bf16.mxu0 %v1617_v15  ;;  %305 = vmatprep.subr.bf16.mxu1 %v1659_v22 }
  0x32   :  { %265 = vmatpush1.bf16.msra.mxu0 %v1641_v19  ;;  %306 = vmatpush1.bf16.msra.mxu1 %v1677_v25 }
  0x33   :  { %266 = vmatprep.subr.bf16.mxu0 %v1647_v20  ;;  %307 = vmatprep.subr.bf16.mxu1 %v1683_v26 }
  0x36   :  { %267 = vmatpush1.bf16.msra.mxu0 %v1665_v23  ;;  %308 = vmatpush1.bf16.msra.mxu1 %v1701_v29 }
  0x37   :  { %268 = vmatprep.subr.bf16.mxu0 %v1670_v24  ;;  %309 = vmatprep.subr.bf16.mxu1 %v1707_v30 }
  0x3a   :  { %269 = vmatpush1.bf16.msra.mxu0 %v1689_v27  ;;  %310 = vmatpush1.bf16.msra.mxu1 %v1720_v32 }
  0x3b   :  { %270 = vmatprep.subr.bf16.mxu0 %v1695_v28  ;;  %311 = vmatprep.subr.bf16.mxu1 %v1726_v33 }
  0x3e   :  { %271 = vmatpush1.bf16.msra.mxu0 %v1713_v31  ;;  %312 = vmatpush1.bf16.msra.mxu1 %v1733_v34 }
  0x3f   :  { %371 = vmatprep.subr.bf16.mxu0 %v1546_v2  ;;  %412 = vmatprep.subr.bf16.mxu1 %v1576_v8 }
  0x41   :  { %289 = vmatmul.mubr.bf16.vlgmr.msra.gmra.mxu0 %v1511_v4  ;;  %330 = vmatmul.mubr.bf16.vlgmr.msra.gmra.mxu1 %v1511_v4 }
  0x42   :  { %372 = vmatpush1.bf16.msra.mxu0 %v1551_v3  ;;  %403 = vmatprep.mubr.bf16.mxu0 %v1511_v4 }
  0x43   :  { %373 = vmatprep.subr.bf16.mxu0 %v1559_v5  ;;  %413 = vmatpush1.bf16.msra.mxu1 %v1581_v9 }
  0x44   :  { %414 = vmatprep.subr.bf16.mxu1 %v1600_v12  ;;  %444 = vmatprep.mubr.bf16.mxu1 %v1511_v4 }
  0x46   :  { %374 = vmatpush1.bf16.msra.mxu0 %v1565_v6 }
  0x47   :  { %375 = vmatprep.subr.bf16.mxu0 %v1571_v7  ;;  %415 = vmatpush1.bf16.msra.mxu1 %v1605_v13 }
  0x48   :  { %416 = vmatprep.subr.bf16.mxu1 %v1622_v16 }
  0x4a   :  { %376 = vmatpush1.bf16.msra.mxu0 %v1587_v10 }
  0x4b   :  { %377 = vmatprep.subr.bf16.mxu0 %v1594_v11  ;;  %417 = vmatpush1.bf16.msra.mxu1 %v1629_v17 }
  0x4c   :  { %418 = vmatprep.subr.bf16.mxu1 %v1635_v18 }
  0x4e   :  { %378 = vmatpush1.bf16.msra.mxu0 %v1612_v14 }
  0x4f   :  { %379 = vmatprep.subr.bf16.mxu0 %v1617_v15  ;;  %419 = vmatpush1.bf16.msra.mxu1 %v1653_v21 }
  0x50   :  { %420 = vmatprep.subr.bf16.mxu1 %v1659_v22 }
  0x52   :  { %380 = vmatpush1.bf16.msra.mxu0 %v1641_v19 }
  0x53   :  { %381 = vmatprep.subr.bf16.mxu0 %v1647_v20  ;;  %421 = vmatpush1.bf16.msra.mxu1 %v1677_v25 }
  0x54   :  { %422 = vmatprep.subr.bf16.mxu1 %v1683_v26 }
  0x56   :  { %382 = vmatpush1.bf16.msra.mxu0 %v1665_v23 }
  0x57   :  { %383 = vmatprep.subr.bf16.mxu0 %v1670_v24  ;;  %423 = vmatpush1.bf16.msra.mxu1 %v1701_v29 }
  0x58   :  { %424 = vmatprep.subr.bf16.mxu1 %v1707_v30 }
  0x5a   :  { %384 = vmatpush1.bf16.msra.mxu0 %v1689_v27 }
  0x5b   :  { %385 = vmatprep.subr.bf16.mxu0 %v1695_v28  ;;  %425 = vmatpush1.bf16.msra.mxu1 %v1720_v32 }
  0x5c   :  { %426 = vmatprep.subr.bf16.mxu1 %v1726_v33 }
  0x5e   :  { %386 = vmatpush1.bf16.msra.mxu0 %v1713_v31 }
  0x5f   :  { %486 = vmatprep.subr.bf16.mxu0 %v1546_v2  ;;  %427 = vmatpush1.bf16.msra.mxu1 %v1733_v34 }
  0x60   :  { %527 = vmatprep.subr.bf16.mxu1 %v1576_v8 }
 0x101   :  { %v290_v36 = vpop.f32.mrf.mxu0  ;;  %v331_v44 = vpop.f32.mrf.mxu1 }
 0x102   :  { %v338_v38 = vadd.f32 %v290_v36, %v60_v35  ;;  %v340_v49 = vadd.f32 %v331_v44, %v62_v47 }
 0x103   :  { %v292_v39 = vpop.f32.mrf.mxu0  ;;  %v333_v46 = vpop.f32.mrf.mxu1 }
 0x104   :  { %v1229_v40 = vmul.f32 -1.442695, %v338_v38  ;;  %v339_v41 = vadd.f32 %v292_v39, %v61_v37  ;;  %v1231_v52 = vmul.f32 -1.442695, %v340_v49  ;;  %v341_v53 = vadd.f32 %v333_v46, %v63_v51  ;;  %v366_v39 = vld [vmem:[#allocation2 + $0x20] sm:$0xff] }
 0x105   :  { %v294_v42 = vpop.f32.mrf.mxu0  ;;  %v335_v48 = vpop.f32.mrf.mxu1 }
 0x106   :  { %1321 = vpow2.f32 %v1229_v40  ;;  %v1230_v43 = vmul.f32 -1.442695, %v339_v41  ;;  %v367_v42 = vld [vmem:[#allocation2 + $0x28] sm:$0xff] }
 0x107   :  { %v295_v45 = vpop.f32.mrf.mxu0  ;;  %v336_v50 = vpop.f32.mrf.mxu1 }
 0x108   :  { %1323 = vpow2.f32 %v1230_v43 }
 0x109   :  { %1325 = vpow2.f32 %v1231_v52 }
 0x10a   :  { %1327 = vtanh.f32 %v341_v53  ;;  %v368_v53 = vld [vmem:[#allocation2 + $0x30] sm:$0xff] }
 0x113   :  { %v1322_v54 = vpop.eup %1321 }
 0x114   :  { %v351_v55 = vadd.f32 1.0, %v1322_v54 }
 0x115   :  { %v1324_v56 = vpop.eup %1323 }
 0x116   :  { %1329 = vrcp.f32 %v351_v55  ;;  %v352_v57 = vadd.f32 1.0, %v1324_v56  ;;  %v1326_v58 = vpop.eup %1325  ;;  %v369_v55 = vld [vmem:[#allocation2 + $0x38] sm:$0xff] }
 0x117   :  { %v1328_v59 = vpop.eup %1327  ;;  %v353_v62 = vadd.f32 1.0, %v1326_v58 }
 0x118   :  { %1331 = vrcp.f32 %v352_v57 }
 0x119   :  { %1333 = vrcp.f32 %v353_v62 }
 0x123   :  { %v1330_v60 = vpop.eup %1329 }
 0x124   :  { %v362_v0 = vmul.f32 %v1330_v60, %v1328_v59 }
 0x125   :  { %v1332_v61 = vpop.eup %1331 }
 0x126   :  { %v361_v63 = vmul.f32 0.0, %v1332_v61  ;;  %v1334_v35 = vpop.eup %1333 }
 0x128   :  { %v1775_v1 = vadd.f32 %v362_v0, %v361_v63 }
 0x12a   :  { %1335 = vtanh.f32 %v1775_v1 }
 0x137   :  { %v1336_v36 = vpop.eup %1335 }
 0x138   :  { %v365_v37 = vmul.f32 %v1336_v36, %v1334_v35 }
 0x13a   :  { %v370_v38 = vpack.c.bf16 %v365_v37, %v365_v37 }
 0x13c   :  { %404 = vmatmul.mubr.bf16.vlgmr.msra.gmra.mxu0 %v370_v38  ;;  %445 = vmatmul.mubr.bf16.vlgmr.msra.gmra.mxu1 %v370_v38 }
 0x13d   :  { %487 = vmatpush1.bf16.msra.mxu0 %v1551_v3  ;;  %528 = vmatpush1.bf16.msra.mxu1 %v1581_v9 }
 0x13e   :  { %488 = vmatprep.subr.bf16.mxu0 %v1559_v5  ;;  %529 = vmatprep.subr.bf16.mxu1 %v1600_v12 }
 0x13f   :  { %518 = vmatprep.mubr.bf16.mxu0 %v1511_v4  ;;  %559 = vmatprep.mubr.bf16.mxu1 %v1511_v4 }
 0x141   :  { %489 = vmatpush1.bf16.msra.mxu0 %v1565_v6  ;;  %530 = vmatpush1.bf16.msra.mxu1 %v1605_v13 }
 0x142   :  { %490 = vmatprep.subr.bf16.mxu0 %v1571_v7  ;;  %531 = vmatprep.subr.bf16.mxu1 %v1622_v16 }
 0x145   :  { %491 = vmatpush1.bf16.msra.mxu0 %v1587_v10  ;;  %532 = vmatpush1.bf16.msra.mxu1 %v1629_v17 }
 0x146   :  { %492 = vmatprep.subr.bf16.mxu0 %v1594_v11  ;;  %533 = vmatprep.subr.bf16.mxu1 %v1635_v18 }
 0x149   :  { %493 = vmatpush1.bf16.msra.mxu0 %v1612_v14  ;;  %534 = vmatpush1.bf16.msra.mxu1 %v1653_v21 }
 0x14a   :  { %494 = vmatprep.subr.bf16.mxu0 %v1617_v15  ;;  %535 = vmatprep.subr.bf16.mxu1 %v1659_v22 }
 0x14d   :  { %495 = vmatpush1.bf16.msra.mxu0 %v1641_v19  ;;  %536 = vmatpush1.bf16.msra.mxu1 %v1677_v25 }
 0x14e   :  { %496 = vmatprep.subr.bf16.mxu0 %v1647_v20  ;;  %537 = vmatprep.subr.bf16.mxu1 %v1683_v26 }
 0x151   :  { %497 = vmatpush1.bf16.msra.mxu0 %v1665_v23  ;;  %538 = vmatpush1.bf16.msra.mxu1 %v1701_v29 }
 0x152   :  { %498 = vmatprep.subr.bf16.mxu0 %v1670_v24  ;;  %539 = vmatprep.subr.bf16.mxu1 %v1707_v30 }
 0x155   :  { %499 = vmatpush1.bf16.msra.mxu0 %v1689_v27  ;;  %540 = vmatpush1.bf16.msra.mxu1 %v1720_v32 }
 0x156   :  { %500 = vmatprep.subr.bf16.mxu0 %v1695_v28  ;;  %541 = vmatprep.subr.bf16.mxu1 %v1726_v33 }
 0x159   :  { %501 = vmatpush1.bf16.msra.mxu0 %v1713_v31  ;;  %542 = vmatpush1.bf16.msra.mxu1 %v1733_v34 }
 0x15a   :  { %601 = vmatprep.subr.bf16.mxu0 %v1546_v2  ;;  %642 = vmatprep.subr.bf16.mxu1 %v1576_v8 }
 0x1fc   :  { %v405_v40 = vpop.f32.mrf.mxu0  ;;  %v446_v41 = vpop.f32.mrf.mxu1 }
 0x1fd   :  { %v453_v43 = vadd.f32 %v405_v40, %v366_v39  ;;  %v455_v54 = vadd.f32 %v446_v41, %v368_v53 }
 0x1fe   :  { %v407_v44 = vpop.f32.mrf.mxu0  ;;  %v448_v45 = vpop.f32.mrf.mxu1 }
 0x1ff   :  { %v1232_v46 = vmul.f32 -1.442695, %v453_v43  ;;  %v454_v47 = vadd.f32 %v407_v44, %v367_v42  ;;  %v1234_v56 = vmul.f32 -1.442695, %v455_v54  ;;  %v456_v58 = vadd.f32 %v448_v45, %v369_v55 }
 0x200   :  { %v409_v48 = vpop.f32.mrf.mxu0  ;;  %v450_v49 = vpop.f32.mrf.mxu1 }
 0x201   :  { %1337 = vpow2.f32 %v1232_v46  ;;  %v1233_v50 = vmul.f32 -1.442695, %v454_v47  ;;  %v482_v46 = vld [vmem:[#allocation2 + $0x48] sm:$0xff] }
 0x202   :  { %v410_v51 = vpop.f32.mrf.mxu0  ;;  %v451_v52 = vpop.f32.mrf.mxu1 }
 0x203   :  { %1339 = vpow2.f32 %v1233_v50 }
 0x204   :  { %1341 = vpow2.f32 %v1234_v56 }
 0x20e   :  { %v1338_v57 = vpop.eup %1337 }
 0x20f   :  { %v466_v59 = vadd.f32 1.0, %v1338_v57  ;;  %v483_v57 = vld [vmem:[#allocation2 + $0x50] sm:$0xff] }
 0x210   :  { %v1340_v60 = vpop.eup %1339 }
 0x211   :  { %1343 = vrcp.f32 %v466_v59  ;;  %v467_v61 = vadd.f32 1.0, %v1340_v60  ;;  %v1342_v62 = vpop.eup %1341  ;;  %v484_v59 = vld [vmem:[#allocation2 + $0x58] sm:$0xff] }
 0x212   :  { %1345 = vtanh.f32 %v456_v58  ;;  %v468_v36 = vadd.f32 1.0, %v1342_v62 }
 0x213   :  { %1347 = vrcp.f32 %v467_v61 }
 0x214   :  { %1349 = vrcp.f32 %v468_v36 }
 0x21e   :  { %v1344_v63 = vpop.eup %1343 }
 0x21f   :  { %v1346_v0 = vpop.eup %1345 }
 0x220   :  { %v1348_v35 = vpop.eup %1347  ;;  %v477_v38 = vmul.f32 %v1346_v0, %v1344_v63 }
 0x221   :  { %v476_v37 = vmul.f32 %v1348_v35, %v1775_v1  ;;  %v1350_v40 = vpop.eup %1349  ;;  %v481_v1 = vld [vmem:[#allocation2 + $0x40] sm:$0xff] }
 0x223   :  { %v1813_v39 = vadd.f32 %v477_v38, %v476_v37 }
 0x225   :  { %1351 = vtanh.f32 %v1813_v39 }
 0x232   :  { %v1352_v41 = vpop.eup %1351 }
 0x233   :  { %v480_v42 = vmul.f32 %v1352_v41, %v1350_v40 }
 0x235   :  { %v485_v43 = vpack.c.bf16 %v480_v42, %v480_v42 }
 0x237   :  { %519 = vmatmul.mubr.bf16.vlgmr.msra.gmra.mxu0 %v485_v43  ;;  %560 = vmatmul.mubr.bf16.vlgmr.msra.gmra.mxu1 %v485_v43 }
 0x238   :  { %602 = vmatpush1.bf16.msra.mxu0 %v1551_v3  ;;  %643 = vmatpush1.bf16.msra.mxu1 %v1581_v9 }
 0x239   :  { %603 = vmatprep.subr.bf16.mxu0 %v1559_v5  ;;  %644 = vmatprep.subr.bf16.mxu1 %v1600_v12 }
 0x23a   :  { %633 = vmatprep.mubr.bf16.mxu0 %v1511_v4  ;;  %674 = vmatprep.mubr.bf16.mxu1 %v1511_v4 }
 0x23c   :  { %604 = vmatpush1.bf16.msra.mxu0 %v1565_v6  ;;  %645 = vmatpush1.bf16.msra.mxu1 %v1605_v13 }
 0x23d   :  { %605 = vmatprep.subr.bf16.mxu0 %v1571_v7  ;;  %646 = vmatprep.subr.bf16.mxu1 %v1622_v16 }
 0x240   :  { %606 = vmatpush1.bf16.msra.mxu0 %v1587_v10  ;;  %647 = vmatpush1.bf16.msra.mxu1 %v1629_v17 }
 0x241   :  { %607 = vmatprep.subr.bf16.mxu0 %v1594_v11  ;;  %648 = vmatprep.subr.bf16.mxu1 %v1635_v18 }
 0x244   :  { %608 = vmatpush1.bf16.msra.mxu0 %v1612_v14  ;;  %649 = vmatpush1.bf16.msra.mxu1 %v1653_v21 }
 0x245   :  { %609 = vmatprep.subr.bf16.mxu0 %v1617_v15  ;;  %650 = vmatprep.subr.bf16.mxu1 %v1659_v22 }
 0x248   :  { %610 = vmatpush1.bf16.msra.mxu0 %v1641_v19  ;;  %651 = vmatpush1.bf16.msra.mxu1 %v1677_v25 }
 0x249   :  { %611 = vmatprep.subr.bf16.mxu0 %v1647_v20  ;;  %652 = vmatprep.subr.bf16.mxu1 %v1683_v26 }
 0x24c   :  { %612 = vmatpush1.bf16.msra.mxu0 %v1665_v23  ;;  %653 = vmatpush1.bf16.msra.mxu1 %v1701_v29 }
 0x24d   :  { %613 = vmatprep.subr.bf16.mxu0 %v1670_v24  ;;  %654 = vmatprep.subr.bf16.mxu1 %v1707_v30 }
 0x250   :  { %614 = vmatpush1.bf16.msra.mxu0 %v1689_v27  ;;  %655 = vmatpush1.bf16.msra.mxu1 %v1720_v32 }
 0x251   :  { %615 = vmatprep.subr.bf16.mxu0 %v1695_v28  ;;  %656 = vmatprep.subr.bf16.mxu1 %v1726_v33 }
 0x254   :  { %616 = vmatpush1.bf16.msra.mxu0 %v1713_v31  ;;  %657 = vmatpush1.bf16.msra.mxu1 %v1733_v34 }
 0x255   :  { %716 = vmatprep.subr.bf16.mxu0 %v1546_v2  ;;  %757 = vmatprep.subr.bf16.mxu1 %v1576_v8 }
 0x2f7   :  { %v520_v44 = vpop.f32.mrf.mxu0  ;;  %v561_v45 = vpop.f32.mrf.mxu1 }
 0x2f8   :  { %v568_v47 = vadd.f32 %v520_v44, %v481_v1  ;;  %v570_v58 = vadd.f32 %v561_v45, %v483_v57 }
 0x2f9   :  { %v522_v48 = vpop.f32.mrf.mxu0  ;;  %v563_v49 = vpop.f32.mrf.mxu1 }
 0x2fa   :  { %v1235_v50 = vmul.f32 -1.442695, %v568_v47  ;;  %v569_v51 = vadd.f32 %v522_v48, %v482_v46  ;;  %v1237_v60 = vmul.f32 -1.442695, %v570_v58  ;;  %v571_v62 = vadd.f32 %v563_v49, %v484_v59 }
 0x2fb   :  { %v524_v52 = vpop.f32.mrf.mxu0  ;;  %v565_v53 = vpop.f32.mrf.mxu1 }
 0x2fc   :  { %1353 = vpow2.f32 %v1235_v50  ;;  %v1236_v54 = vmul.f32 -1.442695, %v569_v51  ;;  %v597_v50 = vld [vmem:[#allocation2 + $0x68] sm:$0xff] }
 0x2fd   :  { %v525_v55 = vpop.f32.mrf.mxu0  ;;  %v566_v56 = vpop.f32.mrf.mxu1 }
 0x2fe   :  { %1355 = vpow2.f32 %v1236_v54 }
 0x2ff   :  { %1357 = vpow2.f32 %v1237_v60 }
 0x309   :  { %v1354_v61 = vpop.eup %1353 }
 0x30a   :  { %v581_v63 = vadd.f32 1.0, %v1354_v61  ;;  %v598_v61 = vld [vmem:[#allocation2 + $0x70] sm:$0xff] }
 0x30b   :  { %v1356_v0 = vpop.eup %1355 }
 0x30c   :  { %1359 = vrcp.f32 %v581_v63  ;;  %v582_v35 = vadd.f32 1.0, %v1356_v0  ;;  %v1358_v36 = vpop.eup %1357  ;;  %v599_v63 = vld [vmem:[#allocation2 + $0x78] sm:$0xff] }
 0x30d   :  { %1361 = vtanh.f32 %v571_v62  ;;  %v583_v41 = vadd.f32 1.0, %v1358_v36 }
 0x30e   :  { %1363 = vrcp.f32 %v582_v35 }
 0x30f   :  { %1365 = vrcp.f32 %v583_v41 }
 0x319   :  { %v1360_v37 = vpop.eup %1359 }
 0x31a   :  { %v1362_v38 = vpop.eup %1361 }
 0x31b   :  { %v1364_v40 = vpop.eup %1363  ;;  %v592_v43 = vmul.f32 %v1362_v38, %v1360_v37 }
 0x31c   :  { %v591_v42 = vmul.f32 %v1364_v40, %v1813_v39  ;;  %v1366_v44 = vpop.eup %1365  ;;  %v596_v39 = vld [vmem:[#allocation2 + $0x60] sm:$0xff] }
 0x31e   :  { %v1851_v1 = vadd.f32 %v592_v43, %v591_v42 }
 0x320   :  { %1367 = vtanh.f32 %v1851_v1 }
 0x32d   :  { %v1368_v45 = vpop.eup %1367 }
 0x32e   :  { %v595_v46 = vmul.f32 %v1368_v45, %v1366_v44 }
 0x330   :  { %v600_v47 = vpack.c.bf16 %v595_v46, %v595_v46 }
 0x332   :  { %634 = vmatmul.mubr.bf16.vlgmr.msra.gmra.mxu0 %v600_v47  ;;  %675 = vmatmul.mubr.bf16.vlgmr.msra.gmra.mxu1 %v600_v47 }
 0x333   :  { %717 = vmatpush1.bf16.msra.mxu0 %v1551_v3  ;;  %758 = vmatpush1.bf16.msra.mxu1 %v1581_v9 }
 0x334   :  { %718 = vmatprep.subr.bf16.mxu0 %v1559_v5  ;;  %759 = vmatprep.subr.bf16.mxu1 %v1600_v12 }
 0x335   :  { %748 = vmatprep.mubr.bf16.mxu0 %v1511_v4  ;;  %789 = vmatprep.mubr.bf16.mxu1 %v1511_v4 }
 0x337   :  { %719 = vmatpush1.bf16.msra.mxu0 %v1565_v6  ;;  %760 = vmatpush1.bf16.msra.mxu1 %v1605_v13 }
 0x338   :  { %720 = vmatprep.subr.bf16.mxu0 %v1571_v7  ;;  %761 = vmatprep.subr.bf16.mxu1 %v1622_v16 }
 0x33b   :  { %721 = vmatpush1.bf16.msra.mxu0 %v1587_v10  ;;  %762 = vmatpush1.bf16.msra.mxu1 %v1629_v17 }
 0x33c   :  { %722 = vmatprep.subr.bf16.mxu0 %v1594_v11  ;;  %763 = vmatprep.subr.bf16.mxu1 %v1635_v18 }
 0x33f   :  { %723 = vmatpush1.bf16.msra.mxu0 %v1612_v14  ;;  %764 = vmatpush1.bf16.msra.mxu1 %v1653_v21 }
 0x340   :  { %724 = vmatprep.subr.bf16.mxu0 %v1617_v15  ;;  %765 = vmatprep.subr.bf16.mxu1 %v1659_v22 }
 0x343   :  { %725 = vmatpush1.bf16.msra.mxu0 %v1641_v19  ;;  %766 = vmatpush1.bf16.msra.mxu1 %v1677_v25 }
 0x344   :  { %726 = vmatprep.subr.bf16.mxu0 %v1647_v20  ;;  %767 = vmatprep.subr.bf16.mxu1 %v1683_v26 }
 0x347   :  { %727 = vmatpush1.bf16.msra.mxu0 %v1665_v23  ;;  %768 = vmatpush1.bf16.msra.mxu1 %v1701_v29 }
 0x348   :  { %728 = vmatprep.subr.bf16.mxu0 %v1670_v24  ;;  %769 = vmatprep.subr.bf16.mxu1 %v1707_v30 }
 0x34b   :  { %729 = vmatpush1.bf16.msra.mxu0 %v1689_v27  ;;  %770 = vmatpush1.bf16.msra.mxu1 %v1720_v32 }
 0x34c   :  { %730 = vmatprep.subr.bf16.mxu0 %v1695_v28  ;;  %771 = vmatprep.subr.bf16.mxu1 %v1726_v33 }
 0x34f   :  { %731 = vmatpush1.bf16.msra.mxu0 %v1713_v31  ;;  %772 = vmatpush1.bf16.msra.mxu1 %v1733_v34 }
 0x350   :  { %831 = vmatprep.subr.bf16.mxu0 %v1546_v2  ;;  %872 = vmatprep.subr.bf16.mxu1 %v1576_v8 }
 0x3f2   :  { %v635_v48 = vpop.f32.mrf.mxu0  ;;  %v676_v49 = vpop.f32.mrf.mxu1 }
 0x3f3   :  { %v683_v51 = vadd.f32 %v635_v48, %v596_v39  ;;  %v685_v62 = vadd.f32 %v676_v49, %v598_v61 }
 0x3f4   :  { %v637_v52 = vpop.f32.mrf.mxu0  ;;  %v678_v53 = vpop.f32.mrf.mxu1 }
 0x3f5   :  { %v1238_v54 = vmul.f32 -1.442695, %v683_v51  ;;  %v684_v55 = vadd.f32 %v637_v52, %v597_v50  ;;  %v1240_v0 = vmul.f32 -1.442695, %v685_v62  ;;  %v686_v36 = vadd.f32 %v678_v53, %v599_v63 }
 0x3f6   :  { %v639_v56 = vpop.f32.mrf.mxu0  ;;  %v680_v57 = vpop.f32.mrf.mxu1 }
 0x3f7   :  { %1369 = vpow2.f32 %v1238_v54  ;;  %v1239_v58 = vmul.f32 -1.442695, %v684_v55  ;;  %v712_v54 = vld [vmem:[#allocation2 + $0x88] sm:$0xff] }
 0x3f8   :  { %v640_v59 = vpop.f32.mrf.mxu0  ;;  %v681_v60 = vpop.f32.mrf.mxu1 }
 0x3f9   :  { %1371 = vpow2.f32 %v1239_v58 }
 0x3fa   :  { %1373 = vpow2.f32 %v1240_v0 }
 0x404   :  { %v1370_v35 = vpop.eup %1369 }
 0x405   :  { %v696_v37 = vadd.f32 1.0, %v1370_v35  ;;  %v713_v35 = vld [vmem:[#allocation2 + $0x90] sm:$0xff] }
 0x406   :  { %v1372_v38 = vpop.eup %1371 }
 0x407   :  { %1375 = vrcp.f32 %v696_v37  ;;  %v697_v40 = vadd.f32 1.0, %v1372_v38  ;;  %v1374_v41 = vpop.eup %1373 }
 0x408   :  { %1377 = vtanh.f32 %v686_v36  ;;  %v698_v45 = vadd.f32 1.0, %v1374_v41  ;;  %v714_v36 = vld [vmem:[#allocation2 + $0x98] sm:$0xff] }
 0x409   :  { %1379 = vrcp.f32 %v697_v40 }
 0x40a   :  { %1381 = vrcp.f32 %v698_v45 }
 0x414   :  { %v1376_v42 = vpop.eup %1375 }
 0x415   :  { %v1378_v43 = vpop.eup %1377 }
 0x416   :  { %v1380_v44 = vpop.eup %1379  ;;  %v707_v47 = vmul.f32 %v1378_v43, %v1376_v42 }
 0x417   :  { %v706_v46 = vmul.f32 %v1380_v44, %v1851_v1  ;;  %v1382_v48 = vpop.eup %1381  ;;  %v711_v1 = vld [vmem:[#allocation2 + $0x80] sm:$0xff] }
 0x419   :  { %v1889_v39 = vadd.f32 %v707_v47, %v706_v46 }
 0x41b   :  { %1383 = vtanh.f32 %v1889_v39 }
 0x428   :  { %v1384_v49 = vpop.eup %1383 }
 0x429   :  { %v710_v50 = vmul.f32 %v1384_v49, %v1382_v48 }
 0x42b   :  { %v715_v51 = vpack.c.bf16 %v710_v50, %v710_v50 }
 0x42d   :  { %749 = vmatmul.mubr.bf16.vlgmr.msra.gmra.mxu0 %v715_v51  ;;  %790 = vmatmul.mubr.bf16.vlgmr.msra.gmra.mxu1 %v715_v51 }
 0x42e   :  { %832 = vmatpush1.bf16.msra.mxu0 %v1551_v3  ;;  %873 = vmatpush1.bf16.msra.mxu1 %v1581_v9 }
 0x42f   :  { %833 = vmatprep.subr.bf16.mxu0 %v1559_v5  ;;  %874 = vmatprep.subr.bf16.mxu1 %v1600_v12 }
 0x430   :  { %863 = vmatprep.mubr.bf16.mxu0 %v1511_v4  ;;  %904 = vmatprep.mubr.bf16.mxu1 %v1511_v4 }
 0x432   :  { %834 = vmatpush1.bf16.msra.mxu0 %v1565_v6  ;;  %875 = vmatpush1.bf16.msra.mxu1 %v1605_v13 }
 0x433   :  { %835 = vmatprep.subr.bf16.mxu0 %v1571_v7  ;;  %876 = vmatprep.subr.bf16.mxu1 %v1622_v16 }
 0x436   :  { %836 = vmatpush1.bf16.msra.mxu0 %v1587_v10  ;;  %877 = vmatpush1.bf16.msra.mxu1 %v1629_v17 }
 0x437   :  { %837 = vmatprep.subr.bf16.mxu0 %v1594_v11  ;;  %878 = vmatprep.subr.bf16.mxu1 %v1635_v18 }
 0x43a   :  { %838 = vmatpush1.bf16.msra.mxu0 %v1612_v14  ;;  %879 = vmatpush1.bf16.msra.mxu1 %v1653_v21 }
 0x43b   :  { %839 = vmatprep.subr.bf16.mxu0 %v1617_v15  ;;  %880 = vmatprep.subr.bf16.mxu1 %v1659_v22 }
 0x43e   :  { %840 = vmatpush1.bf16.msra.mxu0 %v1641_v19  ;;  %881 = vmatpush1.bf16.msra.mxu1 %v1677_v25 }
 0x43f   :  { %841 = vmatprep.subr.bf16.mxu0 %v1647_v20  ;;  %882 = vmatprep.subr.bf16.mxu1 %v1683_v26 }
 0x442   :  { %842 = vmatpush1.bf16.msra.mxu0 %v1665_v23  ;;  %883 = vmatpush1.bf16.msra.mxu1 %v1701_v29 }
 0x443   :  { %843 = vmatprep.subr.bf16.mxu0 %v1670_v24  ;;  %884 = vmatprep.subr.bf16.mxu1 %v1707_v30 }
 0x446   :  { %844 = vmatpush1.bf16.msra.mxu0 %v1689_v27  ;;  %885 = vmatpush1.bf16.msra.mxu1 %v1720_v32 }
 0x447   :  { %845 = vmatprep.subr.bf16.mxu0 %v1695_v28  ;;  %886 = vmatprep.subr.bf16.mxu1 %v1726_v33 }
 0x44a   :  { %846 = vmatpush1.bf16.msra.mxu0 %v1713_v31  ;;  %887 = vmatpush1.bf16.msra.mxu1 %v1733_v34 }
 0x44b   :  { %946 = vmatprep.subr.bf16.mxu0 %v1546_v2  ;;  %987 = vmatprep.subr.bf16.mxu1 %v1576_v8 }
 0x4ed   :  { %v750_v52 = vpop.f32.mrf.mxu0  ;;  %v791_v53 = vpop.f32.mrf.mxu1 }
 0x4ee   :  { %v798_v55 = vadd.f32 %v750_v52, %v711_v1  ;;  %v800_v2 = vadd.f32 %v791_v53, %v713_v35  ;;  %v1456_v35 = vld [vmem:[%s2068_s2 + $0xa4] ss:$16 sps:$4 sm:$0xff]  }
 0x4ef   :  { %v752_v56 = vpop.f32.mrf.mxu0  ;;  %v793_v57 = vpop.f32.mrf.mxu1 }
 0x4f0   :  { %v1241_v58 = vmul.f32 -1.442695, %v798_v55  ;;  %v799_v59 = vadd.f32 %v752_v56, %v712_v54  ;;  %v1243_v37 = vmul.f32 -1.442695, %v800_v2  ;;  %v801_v40 = vadd.f32 %v793_v57, %v714_v36  ;;  %v1457_v2 = vld [vmem:[%s2068_s2 + $0xac] ss:$16 sps:$4 sm:$0xff]  }
 0x4f1   :  { %v754_v60 = vpop.f32.mrf.mxu0  ;;  %v795_v61 = vpop.f32.mrf.mxu1  ;;  %v1459_v36 = vld [vmem:[%s2068_s2 + $0xa8] ss:$16 sps:$4 sm:$0xff]  }
 0x4f2   :  { %1385 = vpow2.f32 %v1241_v58  ;;  %v1242_v62 = vmul.f32 -1.442695, %v799_v59  ;;  %v1450_v59 = vld [vmem:[%s2068_s2 + $0xe0] ss:$16 sps:$4 sm:$0xff]   ;;  %v1451_v60 = vld [vmem:[%s2068_s2 + $0xe8] ss:$16 sps:$4 sm:$0xff]  }
 0x4f3   :  { %v755_v63 = vpop.f32.mrf.mxu0  ;;  %v796_v0 = vpop.f32.mrf.mxu1  ;;  %v1452_v61 = vld [vmem:[%s2068_s2 + $0xc4] ss:$16 sps:$4 sm:$0xff]  }
 0x4f4   :  { %1387 = vpow2.f32 %v1242_v62  ;;  %v1453_v62 = vld [vmem:[%s2068_s2 + $0xcc] ss:$16 sps:$4 sm:$0xff]   ;;  %v1454_v63 = vld [vmem:[%s2068_s2 + $0xc0] ss:$16 sps:$4 sm:$0xff]   ;;  %v1455_v0 = vld [vmem:[%s2068_s2 + $0xc8] ss:$16 sps:$4 sm:$0xff]  }
 0x4f5   :  { %1389 = vpow2.f32 %v1243_v37  ;;  %v1460_v37 = vld [vmem:[%s2068_s2 + $0x84] ss:$16 sps:$4 sm:$0xff]  }
 0x4ff   :  { %v1386_v38 = vpop.eup %1385 }
 0x500   :  { %v811_v41 = vadd.f32 1.0, %v1386_v38  ;;  %v1461_v38 = vld [vmem:[%s2068_s2 + $0x8c] ss:$16 sps:$4 sm:$0xff]  }
 0x501   :  { %v1388_v42 = vpop.eup %1387 }
 0x502   :  { %1391 = vrcp.f32 %v811_v41  ;;  %v812_v43 = vadd.f32 1.0, %v1388_v42  ;;  %v1390_v44 = vpop.eup %1389  ;;  %v1463_v41 = vld [vmem:[%s2068_s2 + $0x88] ss:$16 sps:$4 sm:$0xff]   ;;  %v1464_v42 = vld [vmem:[%s2068_s2 + $0x64] ss:$16 sps:$4 sm:$0xff]  }
 0x503   :  { %1393 = vtanh.f32 %v801_v40  ;;  %v813_v48 = vadd.f32 1.0, %v1390_v44  ;;  %v1462_v40 = vld [vmem:[%s2068_s2 + $0x80] ss:$16 sps:$4 sm:$0xff]  }
 0x504   :  { %1395 = vrcp.f32 %v812_v43  ;;  %v1465_v43 = vld [vmem:[%s2068_s2 + $0x6c] ss:$16 sps:$4 sm:$0xff]   ;;  %v1466_v44 = vld [vmem:[%s2068_s2 + $0x60] ss:$16 sps:$4 sm:$0xff]  }
 0x505   :  { %1397 = vrcp.f32 %v813_v48  ;;  %v1470_v48 = vld [vmem:[%s2068_s2 + $0x40] ss:$16 sps:$4 sm:$0xff]  }
 0x50f   :  { %v1392_v45 = vpop.eup %1391 }
 0x510   :  { %v1394_v46 = vpop.eup %1393 }
 0x511   :  { %v1396_v47 = vpop.eup %1395  ;;  %v822_v50 = vmul.f32 %v1394_v46, %v1392_v45  ;;  %v1467_v45 = vld [vmem:[%s2068_s2 + $0x68] ss:$16 sps:$4 sm:$0xff]   ;;  %v1468_v46 = vld [vmem:[%s2068_s2 + $0x44] ss:$16 sps:$4 sm:$0xff]  }
 0x512   :  { %v821_v49 = vmul.f32 %v1396_v47, %v1889_v39  ;;  %v1398_v1 = vpop.eup %1397  ;;  %v1469_v47 = vld [vmem:[%s2068_s2 + $0x4c] ss:$16 sps:$4 sm:$0xff]  }
 0x514   :  { %v1927_v51 = vadd.f32 %v822_v50, %v821_v49  ;;  %v1471_v49 = vld [vmem:[%s2068_s2 + $0x48] ss:$16 sps:$4 sm:$0xff]   ;;  %v1472_v50 = vld [vmem:[%s2068_s2 + $0x24] ss:$16 sps:$4 sm:$0xff]  }
 0x516   :  { %1399 = vtanh.f32 %v1927_v51 }
 0x523   :  { %v1400_v52 = vpop.eup %1399 }
 0x524   :  { %v825_v53 = vmul.f32 %v1400_v52, %v1398_v1  ;;  %v1474_v1 = vld [vmem:[%s2068_s2 + $0x20] ss:$16 sps:$4 sm:$0xff]   ;;  %v1475_v52 = vld [vmem:[%s2068_s2 + $0x28] ss:$16 sps:$4 sm:$0xff]  }
 0x526   :  { %v830_v54 = vpack.c.bf16 %v825_v53, %v825_v53  ;;  %v1476_v53 = vld [vmem:[%s2068_s2 + $0x4] ss:$16 sps:$4 sm:$0xff]  }
 0x528   :  { %864 = vmatmul.mubr.bf16.vlgmr.msra.gmra.mxu0 %v830_v54  ;;  %905 = vmatmul.mubr.bf16.vlgmr.msra.gmra.mxu1 %v830_v54  ;;  %v1477_v54 = vld [vmem:[%s2068_s2 + $0xc] ss:$16 sps:$4 sm:$0xff]  }
 0x529   :  { %947 = vmatpush1.bf16.msra.mxu0 %v1551_v3  ;;  %988 = vmatpush1.bf16.msra.mxu1 %v1581_v9  ;;  %v1449_v3 = vld [vmem:[%s2068_s2 + $0xe4] ss:$16 sps:$4 sm:$0xff]   ;;  %v827_v9 = vld [vmem:[#allocation2 + $0xa8] sm:$0xff] }
 0x52a   :  { %948 = vmatprep.subr.bf16.mxu0 %v1559_v5  ;;  %989 = vmatprep.subr.bf16.mxu1 %v1600_v12  ;;  %v826_v5 = vld [vmem:[#allocation2 + $0xa0] sm:$0xff] }
 0x52b   :  { %978 = vmatprep.mubr.bf16.mxu0 %v1511_v4  ;;  %1019 = vmatprep.mubr.bf16.mxu1 %v1511_v4 }
 0x52d   :  { %949 = vmatpush1.bf16.msra.mxu0 %v1565_v6  ;;  %990 = vmatpush1.bf16.msra.mxu1 %v1605_v13 }
 0x52e   :  { %950 = vmatprep.subr.bf16.mxu0 %v1571_v7  ;;  %991 = vmatprep.subr.bf16.mxu1 %v1622_v16 }
 0x531   :  { %951 = vmatpush1.bf16.msra.mxu0 %v1587_v10  ;;  %992 = vmatpush1.bf16.msra.mxu1 %v1629_v17 }
 0x532   :  { %952 = vmatprep.subr.bf16.mxu0 %v1594_v11  ;;  %993 = vmatprep.subr.bf16.mxu1 %v1635_v18 }
 0x535   :  { %953 = vmatpush1.bf16.msra.mxu0 %v1612_v14  ;;  %994 = vmatpush1.bf16.msra.mxu1 %v1653_v21 }
 0x536   :  { %954 = vmatprep.subr.bf16.mxu0 %v1617_v15  ;;  %995 = vmatprep.subr.bf16.mxu1 %v1659_v22  ;;  %v829_v22 = vld [vmem:[#allocation2 + $0xb8] sm:$0xff] }
 0x539   :  { %955 = vmatpush1.bf16.msra.mxu0 %v1641_v19  ;;  %996 = vmatpush1.bf16.msra.mxu1 %v1677_v25 }
 0x53a   :  { %956 = vmatprep.subr.bf16.mxu0 %v1647_v20  ;;  %997 = vmatprep.subr.bf16.mxu1 %v1683_v26  ;;  %v828_v20 = vld [vmem:[#allocation2 + $0xb0] sm:$0xff] }
 0x53d   :  { %957 = vmatpush1.bf16.msra.mxu0 %v1665_v23  ;;  %998 = vmatpush1.bf16.msra.mxu1 %v1701_v29 }
 0x53e   :  { %958 = vmatprep.subr.bf16.mxu0 %v1670_v24  ;;  %999 = vmatprep.subr.bf16.mxu1 %v1707_v30 }
 0x541   :  { %959 = vmatpush1.bf16.msra.mxu0 %v1689_v27  ;;  %1000 = vmatpush1.bf16.msra.mxu1 %v1720_v32 }
 0x542   :  { %960 = vmatprep.subr.bf16.mxu0 %v1695_v28  ;;  %1001 = vmatprep.subr.bf16.mxu1 %v1726_v33 }
 0x545   :  { %961 = vmatpush1.bf16.msra.mxu0 %v1713_v31  ;;  %1002 = vmatpush1.bf16.msra.mxu1 %v1733_v34 }
 0x546   :  { %1061 = vmatprep.subr.bf16.mxu0 %v1449_v3  ;;  %1102 = vmatprep.subr.bf16.mxu1 %v1576_v8  ;;  %v1478_v3 = vld [vmem:[%s2068_s2] ss:$16 sps:$4 sm:$0xff]  }
 0x5e8   :  { %v865_v6 = vpop.f32.mrf.mxu0  ;;  %v906_v7 = vpop.f32.mrf.mxu1 }
 0x5e9   :  { %v913_v10 = vadd.f32 %v865_v6, %v826_v5  ;;  %v915_v21 = vadd.f32 %v906_v7, %v828_v20  ;;  %v1479_v5 = vld [vmem:[%s2068_s2 + $0x8] ss:$16 sps:$4 sm:$0xff]   ;;  %v941_v6 = vld [vmem:[#allocation2 + $0xc0] sm:$0xff] }
 0x5ea   :  { %v867_v11 = vpop.f32.mrf.mxu0  ;;  %v908_v12 = vpop.f32.mrf.mxu1 }
 0x5eb   :  { %v1244_v13 = vmul.f32 -1.442695, %v913_v10  ;;  %v914_v14 = vadd.f32 %v867_v11, %v827_v9  ;;  %v1246_v8 = vmul.f32 -1.442695, %v915_v21  ;;  %v916_v24 = vadd.f32 %v908_v12, %v829_v22  ;;  %v942_v10 = vld [vmem:[#allocation2 + $0xc8] sm:$0xff]  ;;  %v943_v21 = vld [vmem:[#allocation2 + $0xd0] sm:$0xff] }
 0x5ec   :  { %v869_v15 = vpop.f32.mrf.mxu0  ;;  %v910_v16 = vpop.f32.mrf.mxu1 }
 0x5ed   :  { %1401 = vpow2.f32 %v1244_v13  ;;  %v1245_v17 = vmul.f32 -1.442695, %v914_v14 }
 0x5ee   :  { %v870_v18 = vpop.f32.mrf.mxu0  ;;  %v911_v19 = vpop.f32.mrf.mxu1 }
 0x5ef   :  { %1403 = vpow2.f32 %v1245_v17 }
 0x5f0   :  { %1405 = vpow2.f32 %v1246_v8  ;;  %v944_v8 = vld [vmem:[#allocation2 + $0xd8] sm:$0xff] }
 0x5fa   :  { %v1402_v23 = vpop.eup %1401 }
 0x5fb   :  { %v926_v25 = vadd.f32 1.0, %v1402_v23 }
 0x5fc   :  { %v1404_v26 = vpop.eup %1403 }
 0x5fd   :  { %1407 = vrcp.f32 %v926_v25  ;;  %v927_v27 = vadd.f32 1.0, %v1404_v26  ;;  %v1406_v28 = vpop.eup %1405 }
 0x5fe   :  { %1409 = vtanh.f32 %v916_v24  ;;  %v928_v32 = vadd.f32 1.0, %v1406_v28 }
 0x5ff   :  { %1411 = vrcp.f32 %v927_v27 }
 0x600   :  { %1413 = vrcp.f32 %v928_v32 }
 0x60a   :  { %v1408_v29 = vpop.eup %1407 }
 0x60b   :  { %v1410_v30 = vpop.eup %1409 }
 0x60c   :  { %v1412_v31 = vpop.eup %1411  ;;  %v937_v34 = vmul.f32 %v1410_v30, %v1408_v29 }
 0x60d   :  { %v936_v33 = vmul.f32 %v1412_v31, %v1927_v51  ;;  %v1414_v55 = vpop.eup %1413  ;;  %v1473_v51 = vld [vmem:[%s2068_s2 + $0x2c] ss:$16 sps:$4 sm:$0xff]  }
 0x60f   :  { %v1967_v39 = vadd.f32 %v937_v34, %v936_v33 }
 0x611   :  { %1415 = vtanh.f32 %v1967_v39 }
 0x61e   :  { %v1416_v56 = vpop.eup %1415 }
 0x61f   :  { %v940_v57 = vmul.f32 %v1416_v56, %v1414_v55 }
 0x621   :  { %v945_v58 = vpack.c.bf16 %v940_v57, %v940_v57 }
 0x623   :  { %979 = vmatmul.mubr.bf16.vlgmr.msra.gmra.mxu0 %v945_v58  ;;  %1020 = vmatmul.mubr.bf16.vlgmr.msra.gmra.mxu1 %v945_v58 }
 0x624   :  { %1062 = vmatpush1.bf16.msra.mxu0 %v1450_v59  ;;  %1103 = vmatpush1.bf16.msra.mxu1 %v1451_v60 }
 0x625   :  { %1063 = vmatprep.subr.bf16.mxu0 %v1452_v61  ;;  %1104 = vmatprep.subr.bf16.mxu1 %v1453_v62  ;;  %v1056_v61 = vld [vmem:[#allocation2 + $0xe0] sm:$0xff] }
 0x626   :  { %1093 = vmatprep.mubr.bf16.mxu0 %v1511_v4  ;;  %1134 = vmatprep.mubr.bf16.mxu1 %v1511_v4  ;;  %v1458_v4 = vld [vmem:[%s2068_s2 + $0xa0] ss:$16 sps:$4 sm:$0xff]  }
 0x628   :  { %1064 = vmatpush1.bf16.msra.mxu0 %v1454_v63  ;;  %1105 = vmatpush1.bf16.msra.mxu1 %v1455_v0  ;;  %v1057_v0 = vld [vmem:[#allocation2 + $0xe8] sm:$0xff] }
 0x629   :  { %1065 = vmatprep.subr.bf16.mxu0 %v1456_v35  ;;  %1106 = vmatprep.subr.bf16.mxu1 %v1457_v2 }
 0x62c   :  { %1066 = vmatpush1.bf16.msra.mxu0 %v1458_v4  ;;  %1107 = vmatpush1.bf16.msra.mxu1 %v1459_v36 }
 0x62d   :  { %1067 = vmatprep.subr.bf16.mxu0 %v1460_v37  ;;  %1108 = vmatprep.subr.bf16.mxu1 %v1461_v38 }
 0x630   :  { %1068 = vmatpush1.bf16.msra.mxu0 %v1462_v40  ;;  %1109 = vmatpush1.bf16.msra.mxu1 %v1463_v41 }
 0x631   :  { %1069 = vmatprep.subr.bf16.mxu0 %v1464_v42  ;;  %1110 = vmatprep.subr.bf16.mxu1 %v1465_v43  ;;  %v1058_v43 = vld [vmem:[#allocation2 + $0xf0] sm:$0xff] }
 0x634   :  { %1070 = vmatpush1.bf16.msra.mxu0 %v1466_v44  ;;  %1111 = vmatpush1.bf16.msra.mxu1 %v1467_v45  ;;  %v1059_v45 = vld [vmem:[#allocation2 + $0xf8] sm:$0xff] }
 0x635   :  { %1071 = vmatprep.subr.bf16.mxu0 %v1468_v46  ;;  %1112 = vmatprep.subr.bf16.mxu1 %v1469_v47 }
 0x638   :  { %1072 = vmatpush1.bf16.msra.mxu0 %v1470_v48  ;;  %1113 = vmatpush1.bf16.msra.mxu1 %v1471_v49 }
 0x639   :  { %1073 = vmatprep.subr.bf16.mxu0 %v1472_v50  ;;  %1114 = vmatprep.subr.bf16.mxu1 %v1473_v51 }
 0x63c   :  { %1074 = vmatpush1.bf16.msra.mxu0 %v1474_v1  ;;  %1115 = vmatpush1.bf16.msra.mxu1 %v1475_v52 }
 0x63d   :  { %1075 = vmatprep.subr.bf16.mxu0 %v1476_v53  ;;  %1116 = vmatprep.subr.bf16.mxu1 %v1477_v54 }
 0x640   :  { %1076 = vmatpush1.bf16.msra.mxu0 %v1478_v3  ;;  %1117 = vmatpush1.bf16.msra.mxu1 %v1479_v5 }
 0x6e3   :  { %v980_v7 = vpop.f32.mrf.mxu0  ;;  %v1021_v9 = vpop.f32.mrf.mxu1 }
 0x6e4   :  { %v1028_v11 = vadd.f32 %v980_v7, %v941_v6  ;;  %v1030_v22 = vadd.f32 %v1021_v9, %v943_v21 }
 0x6e5   :  { %v982_v12 = vpop.f32.mrf.mxu0  ;;  %v1023_v13 = vpop.f32.mrf.mxu1 }
 0x6e6   :  { %v1247_v14 = vmul.f32 -1.442695, %v1028_v11  ;;  %v1029_v15 = vadd.f32 %v982_v12, %v942_v10  ;;  %v1249_v23 = vmul.f32 -1.442695, %v1030_v22  ;;  %v1031_v25 = vadd.f32 %v1023_v13, %v944_v8 }
 0x6e7   :  { %v984_v16 = vpop.f32.mrf.mxu0  ;;  %v1025_v17 = vpop.f32.mrf.mxu1 }
 0x6e8   :  { %1417 = vpow2.f32 %v1247_v14  ;;  %v1248_v18 = vmul.f32 -1.442695, %v1029_v15 }
 0x6e9   :  { %v985_v19 = vpop.f32.mrf.mxu0  ;;  %v1026_v20 = vpop.f32.mrf.mxu1 }
 0x6ea   :  { %1419 = vpow2.f32 %v1248_v18 }
 0x6eb   :  { %1421 = vpow2.f32 %v1249_v23 }
 0x6f5   :  { %v1418_v24 = vpop.eup %1417 }
 0x6f6   :  { %v1041_v26 = vadd.f32 1.0, %v1418_v24 }
 0x6f7   :  { %v1420_v27 = vpop.eup %1419 }
 0x6f8   :  { %1423 = vrcp.f32 %v1041_v26  ;;  %v1042_v28 = vadd.f32 1.0, %v1420_v27  ;;  %v1422_v29 = vpop.eup %1421 }
 0x6f9   :  { %1425 = vtanh.f32 %v1031_v25  ;;  %v1043_v33 = vadd.f32 1.0, %v1422_v29 }
 0x6fa   :  { %1427 = vrcp.f32 %v1042_v28 }
 0x6fb   :  { %1429 = vrcp.f32 %v1043_v33 }
 0x705   :  { %v1424_v30 = vpop.eup %1423 }
 0x706   :  { %v1426_v31 = vpop.eup %1425 }
 0x707   :  { %v1428_v32 = vpop.eup %1427  ;;  %v1052_v55 = vmul.f32 %v1426_v31, %v1424_v30 }
 0x708   :  { %v1051_v34 = vmul.f32 %v1428_v32, %v1967_v39  ;;  %v1430_v57 = vpop.eup %1429 }
 0x70a   :  { %v1053_v56 = vadd.f32 %v1052_v55, %v1051_v34 }
 0x70c   :  { %1431 = vtanh.f32 %v1053_v56 }
 0x719   :  { %v1432_v58 = vpop.eup %1431 }
 0x71a   :  { %v1055_v59 = vmul.f32 %v1432_v58, %v1430_v57 }
 0x71c   :  { %v1060_v60 = vpack.c.bf16 %v1055_v59, %v1055_v59 }
 0x71e   :  { %1094 = vmatmul.mubr.bf16.vlgmr.msra.gmra.mxu0 %v1060_v60  ;;  %1135 = vmatmul.mubr.bf16.vlgmr.msra.gmra.mxu1 %v1060_v60 }
 0x7de   :  { %v1095_v62 = vpop.f32.mrf.mxu0  ;;  %v1136_v63 = vpop.f32.mrf.mxu1 }
 0x7df   :  { %v1143_v35 = vadd.f32 %v1095_v62, %v1056_v61  ;;  %v1145_v44 = vadd.f32 %v1136_v63, %v1058_v43 }
 0x7e0   :  { %v1097_v2 = vpop.f32.mrf.mxu0  ;;  %v1138_v4 = vpop.f32.mrf.mxu1 }
 0x7e1   :  { %v1250_v36 = vmul.f32 -1.442695, %v1143_v35  ;;  %v1144_v37 = vadd.f32 %v1097_v2, %v1057_v0  ;;  %v1252_v46 = vmul.f32 -1.442695, %v1145_v44  ;;  %v1146_v48 = vadd.f32 %v1138_v4, %v1059_v45 }
 0x7e2   :  { %v1099_v39 = vpop.f32.mrf.mxu0  ;;  %v1140_v38 = vpop.f32.mrf.mxu1 }
 0x7e3   :  { %1433 = vpow2.f32 %v1250_v36  ;;  %v1251_v40 = vmul.f32 -1.442695, %v1144_v37 }
 0x7e4   :  { %v1100_v41 = vpop.f32.mrf.mxu0  ;;  %v1141_v42 = vpop.f32.mrf.mxu1 }
 0x7e5   :  { %1435 = vpow2.f32 %v1251_v40 }
 0x7e6   :  { %1437 = vpow2.f32 %v1252_v46 }
 0x7f0   :  { %v1434_v47 = vpop.eup %1433 }
 0x7f1   :  { %v1156_v49 = vadd.f32 1.0, %v1434_v47 }
 0x7f2   :  { %v1436_v50 = vpop.eup %1435 }
 0x7f3   :  { %1439 = vrcp.f32 %v1156_v49  ;;  %v1157_v51 = vadd.f32 1.0, %v1436_v50  ;;  %v1438_v1 = vpop.eup %1437 }
 0x7f4   :  { %1441 = vtanh.f32 %v1146_v48  ;;  %v1158_v3 = vadd.f32 1.0, %v1438_v1 }
 0x7f5   :  { %1443 = vrcp.f32 %v1157_v51 }
 0x7f6   :  { %1445 = vrcp.f32 %v1158_v3 }
 0x800   :  { %v1440_v52 = vpop.eup %1439 }
 0x801   :  { %v1442_v53 = vpop.eup %1441 }
 0x802   :  { %v1444_v54 = vpop.eup %1443  ;;  %v1167_v6 = vmul.f32 %v1442_v53, %v1440_v52 }
 0x803   :  { %v1166_v5 = vmul.f32 %v1444_v54, %v1053_v56  ;;  %v1446_v9 = vpop.eup %1445 }
 0x805   :  { %v1168_v7 = vadd.f32 %v1167_v6, %v1166_v5 }
 0x807   :  { %1447 = vtanh.f32 %v1168_v7 }
 0x814   :  { %v1448_v10 = vpop.eup %1447 }
 0x815   :  { %v1170_v11 = vmul.f32 %v1448_v10, %v1446_v9 }
 0x817   :  { %1171 = vst [vmem:[%s2069_s3] sm:$0xff] %v1170_v11 }

</bundles_post_ra>
